<compile_context>
chip_gen: v5e
topology: v5e:2x2
jax: 0.10.0
libtpu: 0.0.40
codegen_flags: <defaults>
</compile_context>

<pallas_src>
import functools
import math

import jax
import jax.numpy as jnp
from jax import lax
from jax.experimental import pallas as pl
from jax.experimental.pallas import tpu as pltpu

_EPS = 1e-15
_TRANS_LHS = (((0,), (0,)), ((), ()))   # contract over rows:  A^T @ B (no explicit .T)
_TRANS_RHS = (((1,), (1,)), ((), ()))   # contract over cols:  A @ B^T


def _sum_all(x):
    # Full reduce to a (1, 1) tile (2-stage keepdims reduction, vreg friendly).
    return jnp.sum(jnp.sum(x, axis=0, keepdims=True), axis=1, keepdims=True)


def _row_softmax(z):
    m = jnp.max(z, axis=-1, keepdims=True)
    e = jnp.exp(z - m)
    return e * pl.reciprocal(jnp.sum(e, axis=-1, keepdims=True), approx=True)


def _row_tile(n, max_bytes=4 * 1024 * 1024):
    """Row-tile for (tile, N) adjacency blocks: divides N, multiple of 8 (or == N),
    double-buffered tile stays well under the scoped-VMEM default on all chips."""
    if n <= 256:
        return n
    cap = max(8, max_bytes // (4 * n))
    for t in (512, 256, 128, 64, 32, 16, 8):
        if t <= cap and n % t == 0:
            return t
    return n


# ----------------------------------------------------------------------------
# Kernel 1: fused GCN stage (row-tiled, "parallel").
#   AX = adj_tile @ x (computed once), h1 = relu(AX W1),
#   S1/S2 = softmax(AX Wa*), S = a S1 + (1-a) S2,
#   T* = softmax(S*)  (pool-ready; dense_diff_pool softmaxes its input again).
# ----------------------------------------------------------------------------
def _gcn_stage_kernel(adj_ref, x_ref, w1_ref, wa1_ref, wa2_ref, a_ref,
                      h1_ref, s_ref, t1_ref, t2_ref, tb_ref):
    # Dominant N^2 matmul: bf16 MXU inputs (adj is 0/1 -> lossless), f32 accumulate.
    ax = jnp.dot(adj_ref[...].astype(jnp.bfloat16),
                 x_ref[...].astype(jnp.bfloat16),
                 preferred_element_type=jnp.float32)

    h1 = jnp.maximum(
        jnp.dot(ax, w1_ref[...], preferred_element_type=jnp.float32), 0.0)
    h1_ref[...] = h1                                            # x_emb2 rows

    s1 = _row_softmax(jnp.dot(ax, wa1_ref[...], preferred_element_type=jnp.float32))
    s2 = _row_softmax(jnp.dot(ax, wa2_ref[...], preferred_element_type=jnp.float32))
    a = a_ref[...]                                              # (1, 1) broadcast
    s = a * s1 + (1.0 - a) * s2
    s_ref[...] = s

    # Double softmax kept for parity with the reference (PyG pools softmax(s)).
    t1_ref[...] = _row_softmax(s1)
    t2_ref[...] = _row_softmax(s2)
    tb_ref[...] = _row_softmax(s)


def gcn_stage(adj, x, w1, wa1, wa2, a, *, tm):
    n, f = x.shape
    h = w1.shape[1]
    c = wa1.shape[1]
    row = lambda d: pl.BlockSpec((tm, d), lambda i: (i, 0))
    full = lambda r, d: pl.BlockSpec((r, d), lambda i: (0, 0))
    return pl.pallas_call(
        _gcn_stage_kernel,
        out_shape=(
            jax.ShapeDtypeStruct((n, h), jnp.float32),   # h1 / x_emb2
            jax.ShapeDtypeStruct((n, c), jnp.float32),   # S (blend, returned)
            jax.ShapeDtypeStruct((n, c), jnp.float32),   # T1 (pool-ready)
            jax.ShapeDtypeStruct((n, c), jnp.float32),   # T2
            jax.ShapeDtypeStruct((n, c), jnp.float32),   # Tb
        ),
        grid_spec=pltpu.PrefetchScalarGridSpec(
            num_scalar_prefetch=0,
            grid=(n // tm,),
            in_specs=[
                pl.BlockSpec((tm, n), lambda i: (i, 0)),  # adj row tile
                full(n, f),                               # x (resident)
                full(f, h), full(f, c), full(f, c),       # W1, Wa1, Wa2
                full(1, 1),                               # blend scalar a
            ],
            out_specs=(row(h), row(c), row(c), row(c), row(c)),
        ),
        compiler_params=pltpu.CompilerParams(
            dimension_semantics=("parallel",)),
    )(adj, x, w1, wa1, wa2, a)


# ----------------------------------------------------------------------------
# Kernel 2: second GCN hop fused with the THREE dense_diff_pools
# (row-tiled reduction, "arbitrary"; outputs accumulate in resident VMEM).
#   x_emb1_tile = (adj_tile @ h1) @ W2
#   for T in {T1, T2, Tb}:  S^T X, S^T A S, S^T S, entropy  -> accumulated
#   link loss without the (N,N) S S^T temp:
#     ||A - SS^T||_F^2 = ||A||_F^2 - 2 tr(S^T A S) + ||S^T S||_F^2
# ----------------------------------------------------------------------------
def _hop2_diffpool_kernel(adj_ref, h1_ref, w2_ref, t1_ref, t2_ref, tb_ref, eye_ref,
                          xe_ref, xc1_ref, xc2_ref, xcb_ref,
                          ap1_ref, ap2_ref, apb_ref, link_ref, ent_ref,
                          sts1, sts2, stsb, na, *, n_total):
    i = pl.program_id(0)
    last = pl.num_programs(0) - 1
    tm = adj_ref.shape[0]

    @pl.when(i == 0)
    def _init():
        for r in (xc1_ref, xc2_ref, xcb_ref, ap1_ref, ap2_ref, apb_ref,
                  ent_ref, sts1, sts2, stsb, na):
            r[...] = jnp.zeros_like(r)

    adj = adj_ref[...]

    # Second GCN hop for this row tile (bf16 MXU, f32 accumulate).
    ah1 = jnp.dot(adj.astype(jnp.bfloat16), h1_ref[...].astype(jnp.bfloat16),
                  preferred_element_type=jnp.float32)
    xe = jnp.dot(ah1, w2_ref[...], preferred_element_type=jnp.float32)
    xe_ref[...] = xe

    # ||A||_F^2 partial for the link loss.
    na[...] += _sum_all(adj * adj)

    row0 = i * tm
    if tm % 8 == 0:
        row0 = pl.multiple_of(row0, tm)

    def pool(tf_ref, xc_ref, ap_ref, sts_ref):
        t = tf_ref[pl.ds(row0, tm), :]                           # this tile's rows
        xc_ref[...] += lax.dot_general(t, xe, _TRANS_LHS,
                                       preferred_element_type=jnp.float32)   # S^T X
        sta = lax.dot_general(t, adj, _TRANS_LHS,
                              preferred_element_type=jnp.float32)            # (C, N)
        ap_ref[...] += jnp.dot(sta, tf_ref[...],
                               preferred_element_type=jnp.float32)           # S^T A S
        sts_ref[...] += lax.dot_general(t, t, _TRANS_LHS,
                                        preferred_element_type=jnp.float32)  # S^T S
        ent_ref[...] += _sum_all(-t * jnp.log(t + _EPS))

    pool(t1_ref, xc1_ref, ap1_ref, sts1)
    pool(t2_ref, xc2_ref, ap2_ref, sts2)
    pool(tb_ref, xcb_ref, apb_ref, stsb)

    @pl.when(i == last)
    def _finalize():
        diag = eye_ref[...]
        inv_n2 = 1.0 / float(n_total * n_total)

        def link(ap_ref, sts_ref):
            tr = _sum_all(ap_ref[...] * diag)
            sts = sts_ref[...]
            fro2 = na[...] - 2.0 * tr + _sum_all(sts * sts)
            return jnp.sqrt(jnp.maximum(fro2, 0.0)) * inv_n2

        link_ref[...] = (link(ap1_ref, sts1) + link(ap2_ref, sts2)
                         + link(apb_ref, stsb))
        ent_ref[...] = ent_ref[...] * (1.0 / float(n_total))


def hop2_diffpool(adj, h1, w2, t1, t2, tb, *, tm):
    n = adj.shape[0]
    h = w2.shape[1]
    c = t1.shape[1]
    eye = jnp.eye(c, dtype=jnp.float32)
    full = lambda r, d: pl.BlockSpec((r, d), lambda i: (0, 0))
    return pl.pallas_call(
        functools.partial(_hop2_diffpool_kernel, n_total=n),
        out_shape=(
            jax.ShapeDtypeStruct((n, h), jnp.float32),   # x_emb1
            jax.ShapeDtypeStruct((c, h), jnp.float32),   # x_cluster1
            jax.ShapeDtypeStruct((c, h), jnp.float32),   # x_cluster2
            jax.ShapeDtypeStruct((c, h), jnp.float32),   # x_cluster (blend)
            jax.ShapeDtypeStruct((c, c), jnp.float32),   # adj1
            jax.ShapeDtypeStruct((c, c), jnp.float32),   # adj2
            jax.ShapeDtypeStruct((c, c), jnp.float32),   # adj (blend)
            jax.ShapeDtypeStruct((1, 1), jnp.float32),   # link_loss total
            jax.ShapeDtypeStruct((1, 1), jnp.float32),   # entropy_loss total
        ),
        grid_spec=pltpu.PrefetchScalarGridSpec(
            num_scalar_prefetch=0,
            grid=(n // tm,),
            in_specs=[
                pl.BlockSpec((tm, n), lambda i: (i, 0)),  # adj row tile
                full(n, h),                               # h1 (full, resident)
                full(h, h),                               # W2
                full(n, c), full(n, c), full(n, c),       # T1, T2, Tb (resident)
                full(c, c),                               # identity (trace mask)
            ],
            out_specs=(
                pl.BlockSpec((tm, h), lambda i: (i, 0)),
                full(c, h), full(c, h), full(c, h),
                full(c, c), full(c, c), full(c, c),
                full(1, 1), full(1, 1),
            ),
            scratch_shapes=[
                pltpu.VMEM((c, c), jnp.float32),          # S1^T S1 accumulator
                pltpu.VMEM((c, c), jnp.float32),          # S2^T S2
                pltpu.VMEM((c, c), jnp.float32),          # Sb^T Sb
                pltpu.VMEM((1, 1), jnp.float32),          # ||A||_F^2
            ],
        ),
        compiler_params=pltpu.CompilerParams(
            dimension_semantics=("arbitrary",)),
    )(adj, h1, w2, t1, t2, tb, eye)


# ----------------------------------------------------------------------------
# Kernel 3: epilogue — three DEC soft assignments (shared row norms) + KL + MSE
# (row-tiled reduction, "arbitrary").
# ----------------------------------------------------------------------------
def _epilogue_kernel(xe_ref, x_ref, xcb_ref, xc1_ref, xc2_ref,
                     q_ref, q1_ref, q2_ref, kl_ref, mse_ref, *, n_total):
    i = pl.program_id(0)
    last = pl.num_programs(0) - 1

    @pl.when(i == 0)
    def _init():
        kl_ref[...] = jnp.zeros_like(kl_ref)
        mse_ref[...] = jnp.zeros_like(mse_ref)

    xe = xe_ref[...]
    xe2 = jnp.sum(xe * xe, axis=-1, keepdims=True)       # shared row norms

    def soft_assign(xc_ref):
        xc = xc_ref[...]
        xc2 = jnp.sum(xc * xc, axis=-1, keepdims=True)   # (C, 1)
        cross = lax.dot_general(xe, xc, _TRANS_RHS,
                                preferred_element_type=jnp.float32)   # (TM, C)
        dist = jnp.maximum(xe2 + xc2.T - 2.0 * cross, 0.0)            # squared cdist
        q = pl.reciprocal(1.0 + dist, approx=True)                    # v = 1.0
        return q * pl.reciprocal(jnp.sum(q, axis=-1, keepdims=True), approx=True)

    q = soft_assign(xcb_ref)
    q1 = soft_assign(xc1_ref)
    q2 = soft_assign(xc2_ref)
    q_ref[...] = q
    q1_ref[...] = q1
    q2_ref[...] = q2

    # KL(P || (Q+Q1+Q2)/3),  P = rownorm(Q^2 / rowsum(Q)); 0*log(0) handled safely.
    p = q * q * pl.reciprocal(jnp.sum(q, axis=-1, keepdims=True), approx=True)
    p = p * pl.reciprocal(jnp.sum(p, axis=-1, keepdims=True), approx=True)
    mix = (q + q1 + q2) * (1.0 / 3.0)
    term = jnp.where(
        p > 0.0,
        p * (jnp.log(jnp.maximum(p, _EPS)) - jnp.log(jnp.maximum(mix, _EPS))),
        0.0)
    kl_ref[...] += _sum_all(term)

    d = xe - x_ref[...]
    mse_ref[...] += _sum_all(d * d)

    @pl.when(i == last)
    def _finalize():
        mse_ref[...] = mse_ref[...] * (1.0 / float(n_total * xe_ref.shape[1]))


def dec_epilogue(x_emb1, x, xcb, xc1, xc2, *, tm):
    n, h = x_emb1.shape
    c = xcb.shape[0]
    full = lambda r, d: pl.BlockSpec((r, d), lambda i: (0, 0))
    row = lambda d: pl.BlockSpec((tm, d), lambda i: (i, 0))
    return pl.pallas_call(
        functools.partial(_epilogue_kernel, n_total=n),
        out_shape=(
            jax.ShapeDtypeStruct((n, c), jnp.float32),   # Q
            jax.ShapeDtypeStruct((n, c), jnp.float32),   # Q1
            jax.ShapeDtypeStruct((n, c), jnp.float32),   # Q2
            jax.ShapeDtypeStruct((1, 1), jnp.float32),   # kl_div_loss
            jax.ShapeDtypeStruct((1, 1), jnp.float32),   # mse_loss
        ),
        grid_spec=pltpu.PrefetchScalarGridSpec(
            num_scalar_prefetch=0,
            grid=(n // tm,),
            in_specs=[row(h), row(x.shape[1]), full(c, h), full(c, h), full(c, h)],
            out_specs=(row(c), row(c), row(c), full(1, 1), full(1, 1)),
        ),
        compiler_params=pltpu.CompilerParams(
            dimension_semantics=("arbitrary",)),
    )(x_emb1, x, xcb, xc1, xc2)


# ----------------------------------------------------------------------------
# Full HGNN forward
# ----------------------------------------------------------------------------
def hgnn_forward(x, adj, params):
    n, f = x.shape
    h = params["W2"].shape[1]
    assert h == f, "hidden_dim must equal input_dim so mse(x_emb1, x) is valid"
    tm = _row_tile(n)
    a = params["a"].reshape(1, 1).astype(jnp.float32)

    # Stage 1: shared AX + embedding first hop + both assignment heads + blend.
    h1, S, T1, T2, Tb = gcn_stage(adj, x, params["W1"], params["Wa1"],
                                  params["Wa2"], a, tm=tm)

    # Stage 2: second GCN hop fused with the three diff-pools (adj streamed once).
    (x_emb1, xc1, xc2, xcb, ap1, ap2, apb,
     link_tot, ent_tot) = hop2_diffpool(adj, h1, params["W2"], T1, T2, Tb, tm=tm)

    # Stage 3: DEC soft assignments + KL + MSE in one epilogue.
    Q, Q1, Q2, kl, mse = dec_epilogue(x_emb1, x, xcb, xc1, xc2, tm=tm)

    return (x_emb1, S, kl[0, 0], xcb, apb, h1, xc1, ap1, xc2, ap2,
            Q, Q1, Q2, link_tot[0, 0], ent_tot[0, 0], mse[0, 0])


def init_params(input_dim, hidden_dim, n_clusters, seed=42):
    key = jax.random.PRNGKey(seed)
    k1, k2, k3, k4 = jax.random.split(key, 4)

    def glorot(k, shape):
        scale = 1.0 / math.sqrt(shape[0])
        return jax.random.normal(k, shape, dtype=jnp.float32) * scale

    return {
        "W1": glorot(k1, (input_dim, hidden_dim)),
        "W2": glorot(k2, (hidden_dim, hidden_dim)),
        "Wa1": glorot(k3, (input_dim, n_clusters)),
        "Wa2": glorot(k4, (input_dim, n_clusters)),
        "a": jnp.array([0.5], dtype=jnp.float32),
    }


if __name__ == "__main__":
    # Small, forward-consistent shapes.
    n_nodes = 16
    ratio = 0.25
    n_clusters = math.floor(ratio * n_nodes)       # 4
    input_dim = 8
    hidden_dim = input_dim                         # mse(x_emb1, x) shape-valid

    key = jax.random.PRNGKey(0)
    kx, ka = jax.random.split(key)
    x = jax.random.normal(kx, (n_nodes, input_dim), dtype=jnp.float32)
    # symmetric 0/1 adjacency with self-loops
    a_rand = (jax.random.uniform(ka, (n_nodes, n_nodes)) < 0.3).astype(jnp.float32)
    adj = jnp.clip(a_rand + a_rand.T + jnp.eye(n_nodes, dtype=jnp.float32), 0.0, 1.0)

    params = init_params(input_dim, hidden_dim, n_clusters)

    outputs = jax.jit(hgnn_forward)(x, adj, params)
    outputs = jax.block_until_ready(outputs)

    # light sanity checks
    assert outputs[0].shape == (n_nodes, hidden_dim)        # x_emb1
    assert outputs[1].shape == (n_nodes, n_clusters)        # S
    assert outputs[3].shape == (n_clusters, hidden_dim)     # x_cluster
    assert outputs[4].shape == (n_clusters, n_clusters)     # pooled adj
    assert outputs[5].shape == (n_nodes, hidden_dim)        # x_emb2
    assert outputs[10].shape == (n_nodes, n_clusters)       # Q
    for name, val in (("kl", outputs[2]), ("link", outputs[13]),
                      ("ent", outputs[14]), ("mse", outputs[15])):
        assert bool(jnp.isfinite(val)), f"non-finite {name}"
    print("KERNEL_OK")
</pallas_src>

<mosaic_0001>
module attributes {stable_mosaic.version = 11 : i64} {
  func.func @_gcn_stage_kernel(%arg0: i32, %arg1: memref<16x16xf32, #tpu.memory_space<vmem>>, %arg2: memref<16x8xf32, #tpu.memory_space<vmem>>, %arg3: memref<8x8xf32, #tpu.memory_space<vmem>>, %arg4: memref<8x4xf32, #tpu.memory_space<vmem>>, %arg5: memref<8x4xf32, #tpu.memory_space<vmem>>, %arg6: memref<1x1xf32, #tpu.memory_space<vmem>>, %arg7: memref<16x8xf32, #tpu.memory_space<vmem>>, %arg8: memref<16x4xf32, #tpu.memory_space<vmem>>, %arg9: memref<16x4xf32, #tpu.memory_space<vmem>>, %arg10: memref<16x4xf32, #tpu.memory_space<vmem>>, %arg11: memref<16x4xf32, #tpu.memory_space<vmem>>) attributes {dimension_semantics = [#tpu.dimension_semantics<parallel>], iteration_bounds = array<i64: 1>, scalar_prefetch = 0 : i64, scratch_operands = 0 : i64, tpu.core_type = #tpu.core_type<tc>, window_params = [{transform_indices = @transform_0, window_bounds = array<i64: 16, 16>}, {pipeline_mode = #tpu.pipeline_mode<synchronous>, transform_indices = @transform_1, window_bounds = array<i64: 16, 8>}, {pipeline_mode = #tpu.pipeline_mode<synchronous>, transform_indices = @transform_2, window_bounds = array<i64: 8, 8>}, {pipeline_mode = #tpu.pipeline_mode<synchronous>, transform_indices = @transform_3, window_bounds = array<i64: 8, 4>}, {pipeline_mode = #tpu.pipeline_mode<synchronous>, transform_indices = @transform_4, window_bounds = array<i64: 8, 4>}, {pipeline_mode = #tpu.pipeline_mode<synchronous>, transform_indices = @transform_5, window_bounds = array<i64: 1, 1>}, {transform_indices = @transform_6, window_bounds = array<i64: 16, 8>}, {transform_indices = @transform_7, window_bounds = array<i64: 16, 4>}, {transform_indices = @transform_8, window_bounds = array<i64: 16, 4>}, {transform_indices = @transform_9, window_bounds = array<i64: 16, 4>}, {transform_indices = @transform_10, window_bounds = array<i64: 16, 4>}]} {
    %c0 = arith.constant 0 : index
    %c0_0 = arith.constant 0 : index
    %0 = vector.load %arg1[%c0, %c0_0] : memref<16x16xf32, #tpu.memory_space<vmem>>, vector<16x16xf32>
    %1 = arith.truncf %0 : vector<16x16xf32> to vector<16x16xbf16>
    %c0_1 = arith.constant 0 : index
    %c0_2 = arith.constant 0 : index
    %2 = vector.load %arg2[%c0_1, %c0_2] : memref<16x8xf32, #tpu.memory_space<vmem>>, vector<16x8xf32>
    %3 = arith.truncf %2 : vector<16x8xf32> to vector<16x8xbf16>
    %cst = arith.constant dense<0.000000e+00> : vector<16x8xf32>
    %4 = tpu.matmul %1, %3, %cst {dimension_numbers = #tpu.dot_dimension_numbers<[1], [0], [0], [1], [0, 0, 1, 1], [], []>} : vector<16x16xbf16>, vector<16x8xbf16>, vector<16x8xf32> -> vector<16x8xf32>
    %c0_3 = arith.constant 0 : index
    %c0_4 = arith.constant 0 : index
    %5 = vector.load %arg3[%c0_3, %c0_4] : memref<8x8xf32, #tpu.memory_space<vmem>>, vector<8x8xf32>
    %cst_5 = arith.constant dense<0.000000e+00> : vector<16x8xf32>
    %6 = tpu.matmul %4, %5, %cst_5 {dimension_numbers = #tpu.dot_dimension_numbers<[1], [0], [0], [1], [0, 0, 1, 1], [], []>} : vector<16x8xf32>, vector<8x8xf32>, vector<16x8xf32> -> vector<16x8xf32>
    %cst_6 = arith.constant 0.000000e+00 : f32
    %7 = vector.broadcast %cst_6 : f32 to vector<16x8xf32>
    %8 = arith.maximumf %6, %7 : vector<16x8xf32>
    %c0_7 = arith.constant 0 : index
    %c0_8 = arith.constant 0 : index
    %9 = vector.load %arg7[%c0_7, %c0_8] : memref<16x8xf32, #tpu.memory_space<vmem>>, vector<16x8xf32>
    tpu.vector_store %arg7[%c0_7, %c0_8], %8 {strides = array<i32>} : memref<16x8xf32, #tpu.memory_space<vmem>>, vector<16x8xf32>,
    %c0_9 = arith.constant 0 : index
    %c0_10 = arith.constant 0 : index
    %10 = vector.load %arg4[%c0_9, %c0_10] : memref<8x4xf32, #tpu.memory_space<vmem>>, vector<8x4xf32>
    %cst_11 = arith.constant dense<0.000000e+00> : vector<16x4xf32>
    %11 = tpu.matmul %4, %10, %cst_11 {dimension_numbers = #tpu.dot_dimension_numbers<[1], [0], [0], [1], [0, 0, 1, 1], [], []>} : vector<16x8xf32>, vector<8x4xf32>, vector<16x4xf32> -> vector<16x4xf32>
    %cst_12 = arith.constant dense<0xFF800000> : vector<16xf32>
    %12 = vector.multi_reduction <maximumf>, %11, %cst_12 [1] : vector<16x4xf32> to vector<16xf32>
    %13 = vector.shape_cast %12 : vector<16xf32> to vector<16x1xf32>
    %14 = vector.broadcast %13 : vector<16x1xf32> to vector<16x4xf32>
    %15 = arith.subf %11, %14 : vector<16x4xf32>
    %16 = math.exp %15 : vector<16x4xf32>
    %cst_13 = arith.constant dense<0.000000e+00> : vector<16xf32>
    %17 = vector.multi_reduction <add>, %16, %cst_13 [1] : vector<16x4xf32> to vector<16xf32>
    %18 = vector.shape_cast %17 : vector<16xf32> to vector<16x1xf32>
    %19 = tpu.reciprocal %18 {approx = true} : vector<16x1xf32> -> vector<16x1xf32>
    %20 = vector.broadcast %19 : vector<16x1xf32> to vector<16x4xf32>
    %21 = arith.mulf %16, %20 : vector<16x4xf32>
    %c0_14 = arith.constant 0 : index
    %c0_15 = arith.constant 0 : index
    %22 = vector.load %arg5[%c0_14, %c0_15] : memref<8x4xf32, #tpu.memory_space<vmem>>, vector<8x4xf32>
    %cst_16 = arith.constant dense<0.000000e+00> : vector<16x4xf32>
    %23 = tpu.matmul %4, %22, %cst_16 {dimension_numbers = #tpu.dot_dimension_numbers<[1], [0], [0], [1], [0, 0, 1, 1], [], []>} : vector<16x8xf32>, vector<8x4xf32>, vector<16x4xf32> -> vector<16x4xf32>
    %cst_17 = arith.constant dense<0xFF800000> : vector<16xf32>
    %24 = vector.multi_reduction <maximumf>, %23, %cst_17 [1] : vector<16x4xf32> to vector<16xf32>
    %25 = vector.shape_cast %24 : vector<16xf32> to vector<16x1xf32>
    %26 = vector.broadcast %25 : vector<16x1xf32> to vector<16x4xf32>
    %27 = arith.subf %23, %26 : vector<16x4xf32>
    %28 = math.exp %27 : vector<16x4xf32>
    %cst_18 = arith.constant dense<0.000000e+00> : vector<16xf32>
    %29 = vector.multi_reduction <add>, %28, %cst_18 [1] : vector<16x4xf32> to vector<16xf32>
    %30 = vector.shape_cast %29 : vector<16xf32> to vector<16x1xf32>
    %31 = tpu.reciprocal %30 {approx = true} : vector<16x1xf32> -> vector<16x1xf32>
    %32 = vector.broadcast %31 : vector<16x1xf32> to vector<16x4xf32>
    %33 = arith.mulf %28, %32 : vector<16x4xf32>
    %c0_19 = arith.constant 0 : index
    %c0_20 = arith.constant 0 : index
    %34 = vector.load %arg6[%c0_19, %c0_20] : memref<1x1xf32, #tpu.memory_space<vmem>>, vector<1x1xf32>
    %35 = vector.broadcast %34 : vector<1x1xf32> to vector<16x4xf32>
    %36 = arith.mulf %35, %21 : vector<16x4xf32>
    %cst_21 = arith.constant 1.000000e+00 : f32
    %37 = vector.broadcast %cst_21 : f32 to vector<1x1xf32>
    %38 = arith.subf %37, %34 : vector<1x1xf32>
    %39 = vector.broadcast %38 : vector<1x1xf32> to vector<16x4xf32>
    %40 = arith.mulf %39, %33 : vector<16x4xf32>
    %41 = arith.addf %36, %40 : vector<16x4xf32>
    %c0_22 = arith.constant 0 : index
    %c0_23 = arith.constant 0 : index
    %42 = vector.load %arg8[%c0_22, %c0_23] : memref<16x4xf32, #tpu.memory_space<vmem>>, vector<16x4xf32>
    tpu.vector_store %arg8[%c0_22, %c0_23], %41 {strides = array<i32>} : memref<16x4xf32, #tpu.memory_space<vmem>>, vector<16x4xf32>,
    %cst_24 = arith.constant dense<0xFF800000> : vector<16xf32>
    %43 = vector.multi_reduction <maximumf>, %21, %cst_24 [1] : vector<16x4xf32> to vector<16xf32>
    %44 = vector.shape_cast %43 : vector<16xf32> to vector<16x1xf32>
    %45 = vector.broadcast %44 : vector<16x1xf32> to vector<16x4xf32>
    %46 = arith.subf %21, %45 : vector<16x4xf32>
    %47 = math.exp %46 : vector<16x4xf32>
    %cst_25 = arith.constant dense<0.000000e+00> : vector<16xf32>
    %48 = vector.multi_reduction <add>, %47, %cst_25 [1] : vector<16x4xf32> to vector<16xf32>
    %49 = vector.shape_cast %48 : vector<16xf32> to vector<16x1xf32>
    %50 = tpu.reciprocal %49 {approx = true} : vector<16x1xf32> -> vector<16x1xf32>
    %51 = vector.broadcast %50 : vector<16x1xf32> to vector<16x4xf32>
    %52 = arith.mulf %47, %51 : vector<16x4xf32>
    %c0_26 = arith.constant 0 : index
    %c0_27 = arith.constant 0 : index
    %53 = vector.load %arg9[%c0_26, %c0_27] : memref<16x4xf32, #tpu.memory_space<vmem>>, vector<16x4xf32>
    tpu.vector_store %arg9[%c0_26, %c0_27], %52 {strides = array<i32>} : memref<16x4xf32, #tpu.memory_space<vmem>>, vector<16x4xf32>,
    %cst_28 = arith.constant dense<0xFF800000> : vector<16xf32>
    %54 = vector.multi_reduction <maximumf>, %33, %cst_28 [1] : vector<16x4xf32> to vector<16xf32>
    %55 = vector.shape_cast %54 : vector<16xf32> to vector<16x1xf32>
    %56 = vector.broadcast %55 : vector<16x1xf32> to vector<16x4xf32>
    %57 = arith.subf %33, %56 : vector<16x4xf32>
    %58 = math.exp %57 : vector<16x4xf32>
    %cst_29 = arith.constant dense<0.000000e+00> : vector<16xf32>
    %59 = vector.multi_reduction <add>, %58, %cst_29 [1] : vector<16x4xf32> to vector<16xf32>
    %60 = vector.shape_cast %59 : vector<16xf32> to vector<16x1xf32>
    %61 = tpu.reciprocal %60 {approx = true} : vector<16x1xf32> -> vector<16x1xf32>
    %62 = vector.broadcast %61 : vector<16x1xf32> to vector<16x4xf32>
    %63 = arith.mulf %58, %62 : vector<16x4xf32>
    %c0_30 = arith.constant 0 : index
    %c0_31 = arith.constant 0 : index
    %64 = vector.load %arg10[%c0_30, %c0_31] : memref<16x4xf32, #tpu.memory_space<vmem>>, vector<16x4xf32>
    tpu.vector_store %arg10[%c0_30, %c0_31], %63 {strides = array<i32>} : memref<16x4xf32, #tpu.memory_space<vmem>>, vector<16x4xf32>,
    %cst_32 = arith.constant dense<0xFF800000> : vector<16xf32>
    %65 = vector.multi_reduction <maximumf>, %41, %cst_32 [1] : vector<16x4xf32> to vector<16xf32>
    %66 = vector.shape_cast %65 : vector<16xf32> to vector<16x1xf32>
    %67 = vector.broadcast %66 : vector<16x1xf32> to vector<16x4xf32>
    %68 = arith.subf %41, %67 : vector<16x4xf32>
    %69 = math.exp %68 : vector<16x4xf32>
    %cst_33 = arith.constant dense<0.000000e+00> : vector<16xf32>
    %70 = vector.multi_reduction <add>, %69, %cst_33 [1] : vector<16x4xf32> to vector<16xf32>
    %71 = vector.shape_cast %70 : vector<16xf32> to vector<16x1xf32>
    %72 = tpu.reciprocal %71 {approx = true} : vector<16x1xf32> -> vector<16x1xf32>
    %73 = vector.broadcast %72 : vector<16x1xf32> to vector<16x4xf32>
    %74 = arith.mulf %69, %73 : vector<16x4xf32>
    %c0_34 = arith.constant 0 : index
    %c0_35 = arith.constant 0 : index
    %75 = vector.load %arg11[%c0_34, %c0_35] : memref<16x4xf32, #tpu.memory_space<vmem>>, vector<16x4xf32>
    tpu.vector_store %arg11[%c0_34, %c0_35], %74 {strides = array<i32>} : memref<16x4xf32, #tpu.memory_space<vmem>>, vector<16x4xf32>,
    return
  }
  func.func @transform_0(%arg0: i32) -> (i32, i32) {
    %c0_i32 = arith.constant 0 : i32
    %c0_i32_0 = arith.constant 0 : i32
    return %arg0, %c0_i32 : i32, i32
  }
  func.func @transform_1(%arg0: i32) -> (i32, i32) {
    %c0_i32 = arith.constant 0 : i32
    %c0_i32_0 = arith.constant 0 : i32
    %c0_i32_1 = arith.constant 0 : i32
    return %c0_i32, %c0_i32_0 : i32, i32
  }
  func.func @transform_2(%arg0: i32) -> (i32, i32) {
    %c0_i32 = arith.constant 0 : i32
    %c0_i32_0 = arith.constant 0 : i32
    %c0_i32_1 = arith.constant 0 : i32
    return %c0_i32, %c0_i32_0 : i32, i32
  }
  func.func @transform_3(%arg0: i32) -> (i32, i32) {
    %c0_i32 = arith.constant 0 : i32
    %c0_i32_0 = arith.constant 0 : i32
    %c0_i32_1 = arith.constant 0 : i32
    return %c0_i32, %c0_i32_0 : i32, i32
  }
  func.func @transform_4(%arg0: i32) -> (i32, i32) {
    %c0_i32 = arith.constant 0 : i32
    %c0_i32_0 = arith.constant 0 : i32
    %c0_i32_1 = arith.constant 0 : i32
    return %c0_i32, %c0_i32_0 : i32, i32
  }
  func.func @transform_5(%arg0: i32) -> (i32, i32) {
    %c0_i32 = arith.constant 0 : i32
    %c0_i32_0 = arith.constant 0 : i32
    %c0_i32_1 = arith.constant 0 : i32
    return %c0_i32, %c0_i32_0 : i32, i32
  }
  func.func @transform_6(%arg0: i32) -> (i32, i32) {
    %c0_i32 = arith.constant 0 : i32
    %c0_i32_0 = arith.constant 0 : i32
    return %arg0, %c0_i32 : i32, i32
  }
  func.func @transform_7(%arg0: i32) -> (i32, i32) {
    %c0_i32 = arith.constant 0 : i32
    %c0_i32_0 = arith.constant 0 : i32
    return %arg0, %c0_i32 : i32, i32
  }
  func.func @transform_8(%arg0: i32) -> (i32, i32) {
    %c0_i32 = arith.constant 0 : i32
    %c0_i32_0 = arith.constant 0 : i32
    return %arg0, %c0_i32 : i32, i32
  }
  func.func @transform_9(%arg0: i32) -> (i32, i32) {
    %c0_i32 = arith.constant 0 : i32
    %c0_i32_0 = arith.constant 0 : i32
    return %arg0, %c0_i32 : i32, i32
  }
  func.func @transform_10(%arg0: i32) -> (i32, i32) {
    %c0_i32 = arith.constant 0 : i32
    %c0_i32_0 = arith.constant 0 : i32
    return %arg0, %c0_i32 : i32, i32
  }
}

module attributes {stable_mosaic.version = 11 : i64} {
  func.func @_hop2_diffpool_kernel(%arg0: i32, %arg1: memref<16x16xf32, #tpu.memory_space<vmem>>, %arg2: memref<16x8xf32, #tpu.memory_space<vmem>>, %arg3: memref<8x8xf32, #tpu.memory_space<vmem>>, %arg4: memref<16x4xf32, #tpu.memory_space<vmem>>, %arg5: memref<16x4xf32, #tpu.memory_space<vmem>>, %arg6: memref<16x4xf32, #tpu.memory_space<vmem>>, %arg7: memref<4x4xf32, #tpu.memory_space<vmem>>, %arg8: memref<16x8xf32, #tpu.memory_space<vmem>>, %arg9: memref<4x8xf32, #tpu.memory_space<vmem>>, %arg10: memref<4x8xf32, #tpu.memory_space<vmem>>, %arg11: memref<4x8xf32, #tpu.memory_space<vmem>>, %arg12: memref<4x4xf32, #tpu.memory_space<vmem>>, %arg13: memref<4x4xf32, #tpu.memory_space<vmem>>, %arg14: memref<4x4xf32, #tpu.memory_space<vmem>>, %arg15: memref<1x1xf32, #tpu.memory_space<vmem>>, %arg16: memref<1x1xf32, #tpu.memory_space<vmem>>, %arg17: memref<4x4xf32, #tpu.memory_space<vmem>>, %arg18: memref<4x4xf32, #tpu.memory_space<vmem>>, %arg19: memref<4x4xf32, #tpu.memory_space<vmem>>, %arg20: memref<1x1xf32, #tpu.memory_space<vmem>>) attributes {dimension_semantics = [#tpu.dimension_semantics<arbitrary>], iteration_bounds = array<i64: 1>, scalar_prefetch = 0 : i64, scratch_operands = 4 : i64, tpu.core_type = #tpu.core_type<tc>, window_params = [{transform_indices = @transform_0, window_bounds = array<i64: 16, 16>}, {pipeline_mode = #tpu.pipeline_mode<synchronous>, transform_indices = @transform_1, window_bounds = array<i64: 16, 8>}, {pipeline_mode = #tpu.pipeline_mode<synchronous>, transform_indices = @transform_2, window_bounds = array<i64: 8, 8>}, {pipeline_mode = #tpu.pipeline_mode<synchronous>, transform_indices = @transform_3, window_bounds = array<i64: 16, 4>}, {pipeline_mode = #tpu.pipeline_mode<synchronous>, transform_indices = @transform_4, window_bounds = array<i64: 16, 4>}, {pipeline_mode = #tpu.pipeline_mode<synchronous>, transform_indices = @transform_5, window_bounds = array<i64: 16, 4>}, {pipeline_mode = #tpu.pipeline_mode<synchronous>, transform_indices = @transform_6, window_bounds = array<i64: 4, 4>}, {transform_indices = @transform_7, window_bounds = array<i64: 16, 8>}, {pipeline_mode = #tpu.pipeline_mode<synchronous>, transform_indices = @transform_8, window_bounds = array<i64: 4, 8>}, {pipeline_mode = #tpu.pipeline_mode<synchronous>, transform_indices = @transform_9, window_bounds = array<i64: 4, 8>}, {pipeline_mode = #tpu.pipeline_mode<synchronous>, transform_indices = @transform_10, window_bounds = array<i64: 4, 8>}, {pipeline_mode = #tpu.pipeline_mode<synchronous>, transform_indices = @transform_11, window_bounds = array<i64: 4, 4>}, {pipeline_mode = #tpu.pipeline_mode<synchronous>, transform_indices = @transform_12, window_bounds = array<i64: 4, 4>}, {pipeline_mode = #tpu.pipeline_mode<synchronous>, transform_indices = @transform_13, window_bounds = array<i64: 4, 4>}, {pipeline_mode = #tpu.pipeline_mode<synchronous>, transform_indices = @transform_14, window_bounds = array<i64: 1, 1>}, {pipeline_mode = #tpu.pipeline_mode<synchronous>, transform_indices = @transform_15, window_bounds = array<i64: 1, 1>}]} {
    %c0_i32 = arith.constant 0 : i32
    %0 = arith.cmpi eq, %arg0, %c0_i32 : i32
    %1 = arith.extui %0 : i1 to i32
    %c0_i32_0 = arith.constant 0 : i32
    %2 = arith.cmpi ne, %1, %c0_i32_0 : i32
    scf.if %2 {
      %cst_98 = arith.constant 0.000000e+00 : f32
      %111 = vector.broadcast %cst_98 : f32 to vector<4x8xf32>
      %c0_99 = arith.constant 0 : index
      %c0_100 = arith.constant 0 : index
      %112 = vector.load %arg9[%c0_99, %c0_100] : memref<4x8xf32, #tpu.memory_space<vmem>>, vector<4x8xf32>
      tpu.vector_store %arg9[%c0_99, %c0_100], %111 {strides = array<i32>} : memref<4x8xf32, #tpu.memory_space<vmem>>, vector<4x8xf32>,
      %cst_101 = arith.constant 0.000000e+00 : f32
      %113 = vector.broadcast %cst_101 : f32 to vector<4x8xf32>
      %c0_102 = arith.constant 0 : index
      %c0_103 = arith.constant 0 : index
      %114 = vector.load %arg10[%c0_102, %c0_103] : memref<4x8xf32, #tpu.memory_space<vmem>>, vector<4x8xf32>
      tpu.vector_store %arg10[%c0_102, %c0_103], %113 {strides = array<i32>} : memref<4x8xf32, #tpu.memory_space<vmem>>, vector<4x8xf32>,
      %cst_104 = arith.constant 0.000000e+00 : f32
      %115 = vector.broadcast %cst_104 : f32 to vector<4x8xf32>
      %c0_105 = arith.constant 0 : index
      %c0_106 = arith.constant 0 : index
      %116 = vector.load %arg11[%c0_105, %c0_106] : memref<4x8xf32, #tpu.memory_space<vmem>>, vector<4x8xf32>
      tpu.vector_store %arg11[%c0_105, %c0_106], %115 {strides = array<i32>} : memref<4x8xf32, #tpu.memory_space<vmem>>, vector<4x8xf32>,
      %cst_107 = arith.constant 0.000000e+00 : f32
      %117 = vector.broadcast %cst_107 : f32 to vector<4x4xf32>
      %c0_108 = arith.constant 0 : index
      %c0_109 = arith.constant 0 : index
      %118 = vector.load %arg12[%c0_108, %c0_109] : memref<4x4xf32, #tpu.memory_space<vmem>>, vector<4x4xf32>
      tpu.vector_store %arg12[%c0_108, %c0_109], %117 {strides = array<i32>} : memref<4x4xf32, #tpu.memory_space<vmem>>, vector<4x4xf32>,
      %cst_110 = arith.constant 0.000000e+00 : f32
      %119 = vector.broadcast %cst_110 : f32 to vector<4x4xf32>
      %c0_111 = arith.constant 0 : index
      %c0_112 = arith.constant 0 : index
      %120 = vector.load %arg13[%c0_111, %c0_112] : memref<4x4xf32, #tpu.memory_space<vmem>>, vector<4x4xf32>
      tpu.vector_store %arg13[%c0_111, %c0_112], %119 {strides = array<i32>} : memref<4x4xf32, #tpu.memory_space<vmem>>, vector<4x4xf32>,
      %cst_113 = arith.constant 0.000000e+00 : f32
      %121 = vector.broadcast %cst_113 : f32 to vector<4x4xf32>
      %c0_114 = arith.constant 0 : index
      %c0_115 = arith.constant 0 : index
      %122 = vector.load %arg14[%c0_114, %c0_115] : memref<4x4xf32, #tpu.memory_space<vmem>>, vector<4x4xf32>
      tpu.vector_store %arg14[%c0_114, %c0_115], %121 {strides = array<i32>} : memref<4x4xf32, #tpu.memory_space<vmem>>, vector<4x4xf32>,
      %cst_116 = arith.constant 0.000000e+00 : f32
      %123 = vector.broadcast %cst_116 : f32 to vector<1x1xf32>
      %c0_117 = arith.constant 0 : index
      %c0_118 = arith.constant 0 : index
      %124 = vector.load %arg16[%c0_117, %c0_118] : memref<1x1xf32, #tpu.memory_space<vmem>>, vector<1x1xf32>
      tpu.vector_store %arg16[%c0_117, %c0_118], %123 {strides = array<i32>} : memref<1x1xf32, #tpu.memory_space<vmem>>, vector<1x1xf32>,
      %cst_119 = arith.constant 0.000000e+00 : f32
      %125 = vector.broadcast %cst_119 : f32 to vector<4x4xf32>
      %c0_120 = arith.constant 0 : index
      %c0_121 = arith.constant 0 : index
      %126 = vector.load %arg17[%c0_120, %c0_121] : memref<4x4xf32, #tpu.memory_space<vmem>>, vector<4x4xf32>
      tpu.vector_store %arg17[%c0_120, %c0_121], %125 {strides = array<i32>} : memref<4x4xf32, #tpu.memory_space<vmem>>, vector<4x4xf32>,
      %cst_122 = arith.constant 0.000000e+00 : f32
      %127 = vector.broadcast %cst_122 : f32 to vector<4x4xf32>
      %c0_123 = arith.constant 0 : index
      %c0_124 = arith.constant 0 : index
      %128 = vector.load %arg18[%c0_123, %c0_124] : memref<4x4xf32, #tpu.memory_space<vmem>>, vector<4x4xf32>
      tpu.vector_store %arg18[%c0_123, %c0_124], %127 {strides = array<i32>} : memref<4x4xf32, #tpu.memory_space<vmem>>, vector<4x4xf32>,
      %cst_125 = arith.constant 0.000000e+00 : f32
      %129 = vector.broadcast %cst_125 : f32 to vector<4x4xf32>
      %c0_126 = arith.constant 0 : index
      %c0_127 = arith.constant 0 : index
      %130 = vector.load %arg19[%c0_126, %c0_127] : memref<4x4xf32, #tpu.memory_space<vmem>>, vector<4x4xf32>
      tpu.vector_store %arg19[%c0_126, %c0_127], %129 {strides = array<i32>} : memref<4x4xf32, #tpu.memory_space<vmem>>, vector<4x4xf32>,
      %cst_128 = arith.constant 0.000000e+00 : f32
      %131 = vector.broadcast %cst_128 : f32 to vector<1x1xf32>
      %c0_129 = arith.constant 0 : index
      %c0_130 = arith.constant 0 : index
      %132 = vector.load %arg20[%c0_129, %c0_130] : memref<1x1xf32, #tpu.memory_space<vmem>>, vector<1x1xf32>
      tpu.vector_store %arg20[%c0_129, %c0_130], %131 {strides = array<i32>} : memref<1x1xf32, #tpu.memory_space<vmem>>, vector<1x1xf32>,
    } else {
    }
    %c0 = arith.constant 0 : index
    %c0_1 = arith.constant 0 : index
    %3 = vector.load %arg1[%c0, %c0_1] : memref<16x16xf32, #tpu.memory_space<vmem>>, vector<16x16xf32>
    %4 = arith.truncf %3 : vector<16x16xf32> to vector<16x16xbf16>
    %c0_2 = arith.constant 0 : index
    %c0_3 = arith.constant 0 : index
    %5 = vector.load %arg2[%c0_2, %c0_3] : memref<16x8xf32, #tpu.memory_space<vmem>>, vector<16x8xf32>
    %6 = arith.truncf %5 : vector<16x8xf32> to vector<16x8xbf16>
    %cst = arith.constant dense<0.000000e+00> : vector<16x8xf32>
    %7 = tpu.matmul %4, %6, %cst {dimension_numbers = #tpu.dot_dimension_numbers<[1], [0], [0], [1], [0, 0, 1, 1], [], []>} : vector<16x16xbf16>, vector<16x8xbf16>, vector<16x8xf32> -> vector<16x8xf32>
    %c0_4 = arith.constant 0 : index
    %c0_5 = arith.constant 0 : index
    %8 = vector.load %arg3[%c0_4, %c0_5] : memref<8x8xf32, #tpu.memory_space<vmem>>, vector<8x8xf32>
    %cst_6 = arith.constant dense<0.000000e+00> : vector<16x8xf32>
    %9 = tpu.matmul %7, %8, %cst_6 {dimension_numbers = #tpu.dot_dimension_numbers<[1], [0], [0], [1], [0, 0, 1, 1], [], []>} : vector<16x8xf32>, vector<8x8xf32>, vector<16x8xf32> -> vector<16x8xf32>
    %c0_7 = arith.constant 0 : index
    %c0_8 = arith.constant 0 : index
    %10 = vector.load %arg8[%c0_7, %c0_8] : memref<16x8xf32, #tpu.memory_space<vmem>>, vector<16x8xf32>
    tpu.vector_store %arg8[%c0_7, %c0_8], %9 {strides = array<i32>} : memref<16x8xf32, #tpu.memory_space<vmem>>, vector<16x8xf32>,
    %c0_9 = arith.constant 0 : index
    %c0_10 = arith.constant 0 : index
    %11 = vector.load %arg20[%c0_9, %c0_10] : memref<1x1xf32, #tpu.memory_space<vmem>>, vector<1x1xf32>
    %12 = arith.mulf %3, %3 : vector<16x16xf32>
    %cst_11 = arith.constant dense<0.000000e+00> : vector<16xf32>
    %13 = vector.multi_reduction <add>, %12, %cst_11 [0] : vector<16x16xf32> to vector<16xf32>
    %14 = vector.shape_cast %13 : vector<16xf32> to vector<1x16xf32>
    %cst_12 = arith.constant dense<0.000000e+00> : vector<1xf32>
    %15 = vector.multi_reduction <add>, %14, %cst_12 [1] : vector<1x16xf32> to vector<1xf32>
    %16 = vector.shape_cast %15 : vector<1xf32> to vector<1x1xf32>
    %17 = arith.addf %11, %16 : vector<1x1xf32>
    %c0_13 = arith.constant 0 : index
    %c0_14 = arith.constant 0 : index
    %18 = vector.load %arg20[%c0_13, %c0_14] : memref<1x1xf32, #tpu.memory_space<vmem>>, vector<1x1xf32>
    tpu.vector_store %arg20[%c0_13, %c0_14], %17 {strides = array<i32>} : memref<1x1xf32, #tpu.memory_space<vmem>>, vector<1x1xf32>,
    %c16_i32 = arith.constant 16 : i32
    %19 = arith.muli %arg0, %c16_i32 : i32
    %20 = tpu.assume_multiple %19, 16 : i32
    %21 = arith.index_cast %20 : i32 to index
    %c0_15 = arith.constant 0 : index
    %22 = vector.load %arg4[%21, %c0_15] : memref<16x4xf32, #tpu.memory_space<vmem>>, vector<16x4xf32>
    %c0_16 = arith.constant 0 : index
    %c0_17 = arith.constant 0 : index
    %23 = vector.load %arg9[%c0_16, %c0_17] : memref<4x8xf32, #tpu.memory_space<vmem>>, vector<4x8xf32>
    %cst_18 = arith.constant dense<0.000000e+00> : vector<4x8xf32>
    %24 = tpu.matmul %22, %9, %cst_18 {dimension_numbers = #tpu.dot_dimension_numbers<[0], [0], [1], [1], [0, 1, 1, 1], [], []>} : vector<16x4xf32>, vector<16x8xf32>, vector<4x8xf32> -> vector<4x8xf32>
    %25 = arith.addf %23, %24 : vector<4x8xf32>
    %c0_19 = arith.constant 0 : index
    %c0_20 = arith.constant 0 : index
    %26 = vector.load %arg9[%c0_19, %c0_20] : memref<4x8xf32, #tpu.memory_space<vmem>>, vector<4x8xf32>
    tpu.vector_store %arg9[%c0_19, %c0_20], %25 {strides = array<i32>} : memref<4x8xf32, #tpu.memory_space<vmem>>, vector<4x8xf32>,
    %cst_21 = arith.constant dense<0.000000e+00> : vector<4x16xf32>
    %27 = tpu.matmul %22, %3, %cst_21 {dimension_numbers = #tpu.dot_dimension_numbers<[0], [0], [1], [1], [0, 1, 1, 1], [], []>} : vector<16x4xf32>, vector<16x16xf32>, vector<4x16xf32> -> vector<4x16xf32>
    %c0_22 = arith.constant 0 : index
    %c0_23 = arith.constant 0 : index
    %28 = vector.load %arg12[%c0_22, %c0_23] : memref<4x4xf32, #tpu.memory_space<vmem>>, vector<4x4xf32>
    %c0_24 = arith.constant 0 : index
    %c0_25 = arith.constant 0 : index
    %29 = vector.load %arg4[%c0_24, %c0_25] : memref<16x4xf32, #tpu.memory_space<vmem>>, vector<16x4xf32>
    %cst_26 = arith.constant dense<0.000000e+00> : vector<4x4xf32>
    %30 = tpu.matmul %27, %29, %cst_26 {dimension_numbers = #tpu.dot_dimension_numbers<[1], [0], [0], [1], [0, 0, 1, 1], [], []>} : vector<4x16xf32>, vector<16x4xf32>, vector<4x4xf32> -> vector<4x4xf32>
    %31 = arith.addf %28, %30 : vector<4x4xf32>
    %c0_27 = arith.constant 0 : index
    %c0_28 = arith.constant 0 : index
    %32 = vector.load %arg12[%c0_27, %c0_28] : memref<4x4xf32, #tpu.memory_space<vmem>>, vector<4x4xf32>
    tpu.vector_store %arg12[%c0_27, %c0_28], %31 {strides = array<i32>} : memref<4x4xf32, #tpu.memory_space<vmem>>, vector<4x4xf32>,
    %c0_29 = arith.constant 0 : index
    %c0_30 = arith.constant 0 : index
    %33 = vector.load %arg17[%c0_29, %c0_30] : memref<4x4xf32, #tpu.memory_space<vmem>>, vector<4x4xf32>
    %cst_31 = arith.constant dense<0.000000e+00> : vector<4x4xf32>
    %34 = tpu.matmul %22, %22, %cst_31 {dimension_numbers = #tpu.dot_dimension_numbers<[0], [0], [1], [1], [0, 1, 1, 1], [], []>} : vector<16x4xf32>, vector<16x4xf32>, vector<4x4xf32> -> vector<4x4xf32>
    %35 = arith.addf %33, %34 : vector<4x4xf32>
    %c0_32 = arith.constant 0 : index
    %c0_33 = arith.constant 0 : index
    %36 = vector.load %arg17[%c0_32, %c0_33] : memref<4x4xf32, #tpu.memory_space<vmem>>, vector<4x4xf32>
    tpu.vector_store %arg17[%c0_32, %c0_33], %35 {strides = array<i32>} : memref<4x4xf32, #tpu.memory_space<vmem>>, vector<4x4xf32>,
    %c0_34 = arith.constant 0 : index
    %c0_35 = arith.constant 0 : index
    %37 = vector.load %arg16[%c0_34, %c0_35] : memref<1x1xf32, #tpu.memory_space<vmem>>, vector<1x1xf32>
    %cst_36 = arith.constant 0.000000e+00 : f32
    %38 = vector.broadcast %cst_36 : f32 to vector<16x4xf32>
    %39 = arith.subf %38, %22 : vector<16x4xf32>
    %cst_37 = arith.constant 1.000000e-15 : f32
    %40 = vector.broadcast %cst_37 : f32 to vector<16x4xf32>
    %41 = arith.addf %22, %40 : vector<16x4xf32>
    %42 = math.log %41 : vector<16x4xf32>
    %43 = arith.mulf %39, %42 : vector<16x4xf32>
    %cst_38 = arith.constant dense<0.000000e+00> : vector<4xf32>
    %44 = vector.multi_reduction <add>, %43, %cst_38 [0] : vector<16x4xf32> to vector<4xf32>
    %45 = vector.shape_cast %44 : vector<4xf32> to vector<1x4xf32>
    %cst_39 = arith.constant dense<0.000000e+00> : vector<1xf32>
    %46 = vector.multi_reduction <add>, %45, %cst_39 [1] : vector<1x4xf32> to vector<1xf32>
    %47 = vector.shape_cast %46 : vector<1xf32> to vector<1x1xf32>
    %48 = arith.addf %37, %47 : vector<1x1xf32>
    %c0_40 = arith.constant 0 : index
    %c0_41 = arith.constant 0 : index
    %49 = vector.load %arg16[%c0_40, %c0_41] : memref<1x1xf32, #tpu.memory_space<vmem>>, vector<1x1xf32>
    tpu.vector_store %arg16[%c0_40, %c0_41], %48 {strides = array<i32>} : memref<1x1xf32, #tpu.memory_space<vmem>>, vector<1x1xf32>,
    %50 = arith.index_cast %20 : i32 to index
    %c0_42 = arith.constant 0 : index
    %51 = vector.load %arg5[%50, %c0_42] : memref<16x4xf32, #tpu.memory_space<vmem>>, vector<16x4xf32>
    %c0_43 = arith.constant 0 : index
    %c0_44 = arith.constant 0 : index
    %52 = vector.load %arg10[%c0_43, %c0_44] : memref<4x8xf32, #tpu.memory_space<vmem>>, vector<4x8xf32>
    %cst_45 = arith.constant dense<0.000000e+00> : vector<4x8xf32>
    %53 = tpu.matmul %51, %9, %cst_45 {dimension_numbers = #tpu.dot_dimension_numbers<[0], [0], [1], [1], [0, 1, 1, 1], [], []>} : vector<16x4xf32>, vector<16x8xf32>, vector<4x8xf32> -> vector<4x8xf32>
    %54 = arith.addf %52, %53 : vector<4x8xf32>
    %c0_46 = arith.constant 0 : index
    %c0_47 = arith.constant 0 : index
    %55 = vector.load %arg10[%c0_46, %c0_47] : memref<4x8xf32, #tpu.memory_space<vmem>>, vector<4x8xf32>
    tpu.vector_store %arg10[%c0_46, %c0_47], %54 {strides = array<i32>} : memref<4x8xf32, #tpu.memory_space<vmem>>, vector<4x8xf32>,
    %cst_48 = arith.constant dense<0.000000e+00> : vector<4x16xf32>
    %56 = tpu.matmul %51, %3, %cst_48 {dimension_numbers = #tpu.dot_dimension_numbers<[0], [0], [1], [1], [0, 1, 1, 1], [], []>} : vector<16x4xf32>, vector<16x16xf32>, vector<4x16xf32> -> vector<4x16xf32>
    %c0_49 = arith.constant 0 : index
    %c0_50 = arith.constant 0 : index
    %57 = vector.load %arg13[%c0_49, %c0_50] : memref<4x4xf32, #tpu.memory_space<vmem>>, vector<4x4xf32>
    %c0_51 = arith.constant 0 : index
    %c0_52 = arith.constant 0 : index
    %58 = vector.load %arg5[%c0_51, %c0_52] : memref<16x4xf32, #tpu.memory_space<vmem>>, vector<16x4xf32>
    %cst_53 = arith.constant dense<0.000000e+00> : vector<4x4xf32>
    %59 = tpu.matmul %56, %58, %cst_53 {dimension_numbers = #tpu.dot_dimension_numbers<[1], [0], [0], [1], [0, 0, 1, 1], [], []>} : vector<4x16xf32>, vector<16x4xf32>, vector<4x4xf32> -> vector<4x4xf32>
    %60 = arith.addf %57, %59 : vector<4x4xf32>
    %c0_54 = arith.constant 0 : index
    %c0_55 = arith.constant 0 : index
    %61 = vector.load %arg13[%c0_54, %c0_55] : memref<4x4xf32, #tpu.memory_space<vmem>>, vector<4x4xf32>
    tpu.vector_store %arg13[%c0_54, %c0_55], %60 {strides = array<i32>} : memref<4x4xf32, #tpu.memory_space<vmem>>, vector<4x4xf32>,
    %c0_56 = arith.constant 0 : index
    %c0_57 = arith.constant 0 : index
    %62 = vector.load %arg18[%c0_56, %c0_57] : memref<4x4xf32, #tpu.memory_space<vmem>>, vector<4x4xf32>
    %cst_58 = arith.constant dense<0.000000e+00> : vector<4x4xf32>
    %63 = tpu.matmul %51, %51, %cst_58 {dimension_numbers = #tpu.dot_dimension_numbers<[0], [0], [1], [1], [0, 1, 1, 1], [], []>} : vector<16x4xf32>, vector<16x4xf32>, vector<4x4xf32> -> vector<4x4xf32>
    %64 = arith.addf %62, %63 : vector<4x4xf32>
    %c0_59 = arith.constant 0 : index
    %c0_60 = arith.constant 0 : index
    %65 = vector.load %arg18[%c0_59, %c0_60] : memref<4x4xf32, #tpu.memory_space<vmem>>, vector<4x4xf32>
    tpu.vector_store %arg18[%c0_59, %c0_60], %64 {strides = array<i32>} : memref<4x4xf32, #tpu.memory_space<vmem>>, vector<4x4xf32>,
    %c0_61 = arith.constant 0 : index
    %c0_62 = arith.constant 0 : index
    %66 = vector.load %arg16[%c0_61, %c0_62] : memref<1x1xf32, #tpu.memory_space<vmem>>, vector<1x1xf32>
    %cst_63 = arith.constant 0.000000e+00 : f32
    %67 = vector.broadcast %cst_63 : f32 to vector<16x4xf32>
    %68 = arith.subf %67, %51 : vector<16x4xf32>
    %cst_64 = arith.constant 1.000000e-15 : f32
    %69 = vector.broadcast %cst_64 : f32 to vector<16x4xf32>
    %70 = arith.addf %51, %69 : vector<16x4xf32>
    %71 = math.log %70 : vector<16x4xf32>
    %72 = arith.mulf %68, %71 : vector<16x4xf32>
    %cst_65 = arith.constant dense<0.000000e+00> : vector<4xf32>
    %73 = vector.multi_reduction <add>, %72, %cst_65 [0] : vector<16x4xf32> to vector<4xf32>
    %74 = vector.shape_cast %73 : vector<4xf32> to vector<1x4xf32>
    %cst_66 = arith.constant dense<0.000000e+00> : vector<1xf32>
    %75 = vector.multi_reduction <add>, %74, %cst_66 [1] : vector<1x4xf32> to vector<1xf32>
    %76 = vector.shape_cast %75 : vector<1xf32> to vector<1x1xf32>
    %77 = arith.addf %66, %76 : vector<1x1xf32>
    %c0_67 = arith.constant 0 : index
    %c0_68 = arith.constant 0 : index
    %78 = vector.load %arg16[%c0_67, %c0_68] : memref<1x1xf32, #tpu.memory_space<vmem>>, vector<1x1xf32>
    tpu.vector_store %arg16[%c0_67, %c0_68], %77 {strides = array<i32>} : memref<1x1xf32, #tpu.memory_space<vmem>>, vector<1x1xf32>,
    %79 = arith.index_cast %20 : i32 to index
    %c0_69 = arith.constant 0 : index
    %80 = vector.load %arg6[%79, %c0_69] : memref<16x4xf32, #tpu.memory_space<vmem>>, vector<16x4xf32>
    %c0_70 = arith.constant 0 : index
    %c0_71 = arith.constant 0 : index
    %81 = vector.load %arg11[%c0_70, %c0_71] : memref<4x8xf32, #tpu.memory_space<vmem>>, vector<4x8xf32>
    %cst_72 = arith.constant dense<0.000000e+00> : vector<4x8xf32>
    %82 = tpu.matmul %80, %9, %cst_72 {dimension_numbers = #tpu.dot_dimension_numbers<[0], [0], [1], [1], [0, 1, 1, 1], [], []>} : vector<16x4xf32>, vector<16x8xf32>, vector<4x8xf32> -> vector<4x8xf32>
    %83 = arith.addf %81, %82 : vector<4x8xf32>
    %c0_73 = arith.constant 0 : index
    %c0_74 = arith.constant 0 : index
    %84 = vector.load %arg11[%c0_73, %c0_74] : memref<4x8xf32, #tpu.memory_space<vmem>>, vector<4x8xf32>
    tpu.vector_store %arg11[%c0_73, %c0_74], %83 {strides = array<i32>} : memref<4x8xf32, #tpu.memory_space<vmem>>, vector<4x8xf32>,
    %cst_75 = arith.constant dense<0.000000e+00> : vector<4x16xf32>
    %85 = tpu.matmul %80, %3, %cst_75 {dimension_numbers = #tpu.dot_dimension_numbers<[0], [0], [1], [1], [0, 1, 1, 1], [], []>} : vector<16x4xf32>, vector<16x16xf32>, vector<4x16xf32> -> vector<4x16xf32>
    %c0_76 = arith.constant 0 : index
    %c0_77 = arith.constant 0 : index
    %86 = vector.load %arg14[%c0_76, %c0_77] : memref<4x4xf32, #tpu.memory_space<vmem>>, vector<4x4xf32>
    %c0_78 = arith.constant 0 : index
    %c0_79 = arith.constant 0 : index
    %87 = vector.load %arg6[%c0_78, %c0_79] : memref<16x4xf32, #tpu.memory_space<vmem>>, vector<16x4xf32>
    %cst_80 = arith.constant dense<0.000000e+00> : vector<4x4xf32>
    %88 = tpu.matmul %85, %87, %cst_80 {dimension_numbers = #tpu.dot_dimension_numbers<[1], [0], [0], [1], [0, 0, 1, 1], [], []>} : vector<4x16xf32>, vector<16x4xf32>, vector<4x4xf32> -> vector<4x4xf32>
    %89 = arith.addf %86, %88 : vector<4x4xf32>
    %c0_81 = arith.constant 0 : index
    %c0_82 = arith.constant 0 : index
    %90 = vector.load %arg14[%c0_81, %c0_82] : memref<4x4xf32, #tpu.memory_space<vmem>>, vector<4x4xf32>
    tpu.vector_store %arg14[%c0_81, %c0_82], %89 {strides = array<i32>} : memref<4x4xf32, #tpu.memory_space<vmem>>, vector<4x4xf32>,
    %c0_83 = arith.constant 0 : index
    %c0_84 = arith.constant 0 : index
    %91 = vector.load %arg19[%c0_83, %c0_84] : memref<4x4xf32, #tpu.memory_space<vmem>>, vector<4x4xf32>
    %cst_85 = arith.constant dense<0.000000e+00> : vector<4x4xf32>
    %92 = tpu.matmul %80, %80, %cst_85 {dimension_numbers = #tpu.dot_dimension_numbers<[0], [0], [1], [1], [0, 1, 1, 1], [], []>} : vector<16x4xf32>, vector<16x4xf32>, vector<4x4xf32> -> vector<4x4xf32>
    %93 = arith.addf %91, %92 : vector<4x4xf32>
    %c0_86 = arith.constant 0 : index
    %c0_87 = arith.constant 0 : index
    %94 = vector.load %arg19[%c0_86, %c0_87] : memref<4x4xf32, #tpu.memory_space<vmem>>, vector<4x4xf32>
    tpu.vector_store %arg19[%c0_86, %c0_87], %93 {strides = array<i32>} : memref<4x4xf32, #tpu.memory_space<vmem>>, vector<4x4xf32>,
    %c0_88 = arith.constant 0 : index
    %c0_89 = arith.constant 0 : index
    %95 = vector.load %arg16[%c0_88, %c0_89] : memref<1x1xf32, #tpu.memory_space<vmem>>, vector<1x1xf32>
    %cst_90 = arith.constant 0.000000e+00 : f32
    %96 = vector.broadcast %cst_90 : f32 to vector<16x4xf32>
    %97 = arith.subf %96, %80 : vector<16x4xf32>
    %cst_91 = arith.constant 1.000000e-15 : f32
    %98 = vector.broadcast %cst_91 : f32 to vector<16x4xf32>
    %99 = arith.addf %80, %98 : vector<16x4xf32>
    %100 = math.log %99 : vector<16x4xf32>
    %101 = arith.mulf %97, %100 : vector<16x4xf32>
    %cst_92 = arith.constant dense<0.000000e+00> : vector<4xf32>
    %102 = vector.multi_reduction <add>, %101, %cst_92 [0] : vector<16x4xf32> to vector<4xf32>
    %103 = vector.shape_cast %102 : vector<4xf32> to vector<1x4xf32>
    %cst_93 = arith.constant dense<0.000000e+00> : vector<1xf32>
    %104 = vector.multi_reduction <add>, %103, %cst_93 [1] : vector<1x4xf32> to vector<1xf32>
    %105 = vector.shape_cast %104 : vector<1xf32> to vector<1x1xf32>
    %106 = arith.addf %95, %105 : vector<1x1xf32>
    %c0_94 = arith.constant 0 : index
    %c0_95 = arith.constant 0 : index
    %107 = vector.load %arg16[%c0_94, %c0_95] : memref<1x1xf32, #tpu.memory_space<vmem>>, vector<1x1xf32>
    tpu.vector_store %arg16[%c0_94, %c0_95], %106 {strides = array<i32>} : memref<1x1xf32, #tpu.memory_space<vmem>>, vector<1x1xf32>,
    %c0_i32_96 = arith.constant 0 : i32
    %108 = arith.cmpi eq, %arg0, %c0_i32_96 : i32
    %109 = arith.extui %108 : i1 to i32
    %c0_i32_97 = arith.constant 0 : i32
    %110 = arith.cmpi ne, %109, %c0_i32_97 : i32
    scf.if %110 {
      %c0_98 = arith.constant 0 : index
      %c0_99 = arith.constant 0 : index
      %111 = vector.load %arg7[%c0_98, %c0_99] : memref<4x4xf32, #tpu.memory_space<vmem>>, vector<4x4xf32>
      %c0_100 = arith.constant 0 : index
      %c0_101 = arith.constant 0 : index
      %112 = vector.load %arg12[%c0_100, %c0_101] : memref<4x4xf32, #tpu.memory_space<vmem>>, vector<4x4xf32>
      %113 = arith.mulf %112, %111 : vector<4x4xf32>
      %cst_102 = arith.constant dense<0.000000e+00> : vector<4xf32>
      %114 = vector.multi_reduction <add>, %113, %cst_102 [0] : vector<4x4xf32> to vector<4xf32>
      %115 = vector.shape_cast %114 : vector<4xf32> to vector<1x4xf32>
      %cst_103 = arith.constant dense<0.000000e+00> : vector<1xf32>
      %116 = vector.multi_reduction <add>, %115, %cst_103 [1] : vector<1x4xf32> to vector<1xf32>
      %117 = vector.shape_cast %116 : vector<1xf32> to vector<1x1xf32>
      %c0_104 = arith.constant 0 : index
      %c0_105 = arith.constant 0 : index
      %118 = vector.load %arg17[%c0_104, %c0_105] : memref<4x4xf32, #tpu.memory_space<vmem>>, vector<4x4xf32>
      %c0_106 = arith.constant 0 : index
      %c0_107 = arith.constant 0 : index
      %119 = vector.load %arg20[%c0_106, %c0_107] : memref<1x1xf32, #tpu.memory_space<vmem>>, vector<1x1xf32>
      %cst_108 = arith.constant 2.000000e+00 : f32
      %120 = vector.broadcast %cst_108 : f32 to vector<1x1xf32>
      %121 = arith.mulf %120, %117 : vector<1x1xf32>
      %122 = arith.subf %119, %121 : vector<1x1xf32>
      %123 = arith.mulf %118, %118 : vector<4x4xf32>
      %cst_109 = arith.constant dense<0.000000e+00> : vector<4xf32>
      %124 = vector.multi_reduction <add>, %123, %cst_109 [0] : vector<4x4xf32> to vector<4xf32>
      %125 = vector.shape_cast %124 : vector<4xf32> to vector<1x4xf32>
      %cst_110 = arith.constant dense<0.000000e+00> : vector<1xf32>
      %126 = vector.multi_reduction <add>, %125, %cst_110 [1] : vector<1x4xf32> to vector<1xf32>
      %127 = vector.shape_cast %126 : vector<1xf32> to vector<1x1xf32>
      %128 = arith.addf %122, %127 : vector<1x1xf32>
      %cst_111 = arith.constant 0.000000e+00 : f32
      %129 = vector.broadcast %cst_111 : f32 to vector<1x1xf32>
      %130 = arith.maximumf %128, %129 : vector<1x1xf32>
      %131 = math.sqrt %130 : vector<1x1xf32>
      %cst_112 = arith.constant 3.906250e-03 : f32
      %132 = vector.broadcast %cst_112 : f32 to vector<1x1xf32>
      %133 = arith.mulf %131, %132 : vector<1x1xf32>
      %c0_113 = arith.constant 0 : index
      %c0_114 = arith.constant 0 : index
      %134 = vector.load %arg13[%c0_113, %c0_114] : memref<4x4xf32, #tpu.memory_space<vmem>>, vector<4x4xf32>
      %135 = arith.mulf %134, %111 : vector<4x4xf32>
      %cst_115 = arith.constant dense<0.000000e+00> : vector<4xf32>
      %136 = vector.multi_reduction <add>, %135, %cst_115 [0] : vector<4x4xf32> to vector<4xf32>
      %137 = vector.shape_cast %136 : vector<4xf32> to vector<1x4xf32>
      %cst_116 = arith.constant dense<0.000000e+00> : vector<1xf32>
      %138 = vector.multi_reduction <add>, %137, %cst_116 [1] : vector<1x4xf32> to vector<1xf32>
      %139 = vector.shape_cast %138 : vector<1xf32> to vector<1x1xf32>
      %c0_117 = arith.constant 0 : index
      %c0_118 = arith.constant 0 : index
      %140 = vector.load %arg18[%c0_117, %c0_118] : memref<4x4xf32, #tpu.memory_space<vmem>>, vector<4x4xf32>
      %c0_119 = arith.constant 0 : index
      %c0_120 = arith.constant 0 : index
      %141 = vector.load %arg20[%c0_119, %c0_120] : memref<1x1xf32, #tpu.memory_space<vmem>>, vector<1x1xf32>
      %cst_121 = arith.constant 2.000000e+00 : f32
      %142 = vector.broadcast %cst_121 : f32 to vector<1x1xf32>
      %143 = arith.mulf %142, %139 : vector<1x1xf32>
      %144 = arith.subf %141, %143 : vector<1x1xf32>
      %145 = arith.mulf %140, %140 : vector<4x4xf32>
      %cst_122 = arith.constant dense<0.000000e+00> : vector<4xf32>
      %146 = vector.multi_reduction <add>, %145, %cst_122 [0] : vector<4x4xf32> to vector<4xf32>
      %147 = vector.shape_cast %146 : vector<4xf32> to vector<1x4xf32>
      %cst_123 = arith.constant dense<0.000000e+00> : vector<1xf32>
      %148 = vector.multi_reduction <add>, %147, %cst_123 [1] : vector<1x4xf32> to vector<1xf32>
      %149 = vector.shape_cast %148 : vector<1xf32> to vector<1x1xf32>
      %150 = arith.addf %144, %149 : vector<1x1xf32>
      %cst_124 = arith.constant 0.000000e+00 : f32
      %151 = vector.broadcast %cst_124 : f32 to vector<1x1xf32>
      %152 = arith.maximumf %150, %151 : vector<1x1xf32>
      %153 = math.sqrt %152 : vector<1x1xf32>
      %cst_125 = arith.constant 3.906250e-03 : f32
      %154 = vector.broadcast %cst_125 : f32 to vector<1x1xf32>
      %155 = arith.mulf %153, %154 : vector<1x1xf32>
      %156 = arith.addf %133, %155 : vector<1x1xf32>
      %c0_126 = arith.constant 0 : index
      %c0_127 = arith.constant 0 : index
      %157 = vector.load %arg14[%c0_126, %c0_127] : memref<4x4xf32, #tpu.memory_space<vmem>>, vector<4x4xf32>
      %158 = arith.mulf %157, %111 : vector<4x4xf32>
      %cst_128 = arith.constant dense<0.000000e+00> : vector<4xf32>
      %159 = vector.multi_reduction <add>, %158, %cst_128 [0] : vector<4x4xf32> to vector<4xf32>
      %160 = vector.shape_cast %159 : vector<4xf32> to vector<1x4xf32>
      %cst_129 = arith.constant dense<0.000000e+00> : vector<1xf32>
      %161 = vector.multi_reduction <add>, %160, %cst_129 [1] : vector<1x4xf32> to vector<1xf32>
      %162 = vector.shape_cast %161 : vector<1xf32> to vector<1x1xf32>
      %c0_130 = arith.constant 0 : index
      %c0_131 = arith.constant 0 : index
      %163 = vector.load %arg19[%c0_130, %c0_131] : memref<4x4xf32, #tpu.memory_space<vmem>>, vector<4x4xf32>
      %c0_132 = arith.constant 0 : index
      %c0_133 = arith.constant 0 : index
      %164 = vector.load %arg20[%c0_132, %c0_133] : memref<1x1xf32, #tpu.memory_space<vmem>>, vector<1x1xf32>
      %cst_134 = arith.constant 2.000000e+00 : f32
      %165 = vector.broadcast %cst_134 : f32 to vector<1x1xf32>
      %166 = arith.mulf %165, %162 : vector<1x1xf32>
      %167 = arith.subf %164, %166 : vector<1x1xf32>
      %168 = arith.mulf %163, %163 : vector<4x4xf32>
      %cst_135 = arith.constant dense<0.000000e+00> : vector<4xf32>
      %169 = vector.multi_reduction <add>, %168, %cst_135 [0] : vector<4x4xf32> to vector<4xf32>
      %170 = vector.shape_cast %169 : vector<4xf32> to vector<1x4xf32>
      %cst_136 = arith.constant dense<0.000000e+00> : vector<1xf32>
      %171 = vector.multi_reduction <add>, %170, %cst_136 [1] : vector<1x4xf32> to vector<1xf32>
      %172 = vector.shape_cast %171 : vector<1xf32> to vector<1x1xf32>
      %173 = arith.addf %167, %172 : vector<1x1xf32>
      %cst_137 = arith.constant 0.000000e+00 : f32
      %174 = vector.broadcast %cst_137 : f32 to vector<1x1xf32>
      %175 = arith.maximumf %173, %174 : vector<1x1xf32>
      %176 = math.sqrt %175 : vector<1x1xf32>
      %cst_138 = arith.constant 3.906250e-03 : f32
      %177 = vector.broadcast %cst_138 : f32 to vector<1x1xf32>
      %178 = arith.mulf %176, %177 : vector<1x1xf32>
      %179 = arith.addf %156, %178 : vector<1x1xf32>
      %c0_139 = arith.constant 0 : index
      %c0_140 = arith.constant 0 : index
      %180 = vector.load %arg15[%c0_139, %c0_140] : memref<1x1xf32, #tpu.memory_space<vmem>>, vector<1x1xf32>
      tpu.vector_store %arg15[%c0_139, %c0_140], %179 {strides = array<i32>} : memref<1x1xf32, #tpu.memory_space<vmem>>, vector<1x1xf32>,
      %c0_141 = arith.constant 0 : index
      %c0_142 = arith.constant 0 : index
      %181 = vector.load %arg16[%c0_141, %c0_142] : memref<1x1xf32, #tpu.memory_space<vmem>>, vector<1x1xf32>
      %cst_143 = arith.constant 6.250000e-02 : f32
      %182 = vector.broadcast %cst_143 : f32 to vector<1x1xf32>
      %183 = arith.mulf %181, %182 : vector<1x1xf32>
      %c0_144 = arith.constant 0 : index
      %c0_145 = arith.constant 0 : index
      %184 = vector.load %arg16[%c0_144, %c0_145] : memref<1x1xf32, #tpu.memory_space<vmem>>, vector<1x1xf32>
      tpu.vector_store %arg16[%c0_144, %c0_145], %183 {strides = array<i32>} : memref<1x1xf32, #tpu.memory_space<vmem>>, vector<1x1xf32>,
    } else {
    }
    return
  }
  func.func @transform_0(%arg0: i32) -> (i32, i32) {
    %c0_i32 = arith.constant 0 : i32
    %c0_i32_0 = arith.constant 0 : i32
    return %arg0, %c0_i32 : i32, i32
  }
  func.func @transform_1(%arg0: i32) -> (i32, i32) {
    %c0_i32 = arith.constant 0 : i32
    %c0_i32_0 = arith.constant 0 : i32
    %c0_i32_1 = arith.constant 0 : i32
    return %c0_i32, %c0_i32_0 : i32, i32
  }
  func.func @transform_2(%arg0: i32) -> (i32, i32) {
    %c0_i32 = arith.constant 0 : i32
    %c0_i32_0 = arith.constant 0 : i32
    %c0_i32_1 = arith.constant 0 : i32
    return %c0_i32, %c0_i32_0 : i32, i32
  }
  func.func @transform_3(%arg0: i32) -> (i32, i32) {
    %c0_i32 = arith.constant 0 : i32
    %c0_i32_0 = arith.constant 0 : i32
    %c0_i32_1 = arith.constant 0 : i32
    return %c0_i32, %c0_i32_0 : i32, i32
  }
  func.func @transform_4(%arg0: i32) -> (i32, i32) {
    %c0_i32 = arith.constant 0 : i32
    %c0_i32_0 = arith.constant 0 : i32
    %c0_i32_1 = arith.constant 0 : i32
    return %c0_i32, %c0_i32_0 : i32, i32
  }
  func.func @transform_5(%arg0: i32) -> (i32, i32) {
    %c0_i32 = arith.constant 0 : i32
    %c0_i32_0 = arith.constant 0 : i32
    %c0_i32_1 = arith.constant 0 : i32
    return %c0_i32, %c0_i32_0 : i32, i32
  }
  func.func @transform_6(%arg0: i32) -> (i32, i32) {
    %c0_i32 = arith.constant 0 : i32
    %c0_i32_0 = arith.constant 0 : i32
    %c0_i32_1 = arith.constant 0 : i32
    return %c0_i32, %c0_i32_0 : i32, i32
  }
  func.func @transform_7(%arg0: i32) -> (i32, i32) {
    %c0_i32 = arith.constant 0 : i32
    %c0_i32_0 = arith.constant 0 : i32
    return %arg0, %c0_i32 : i32, i32
  }
  func.func @transform_8(%arg0: i32) -> (i32, i32) {
    %c0_i32 = arith.constant 0 : i32
    %c0_i32_0 = arith.constant 0 : i32
    %c0_i32_1 = arith.constant 0 : i32
    return %c0_i32, %c0_i32_0 : i32, i32
  }
  func.func @transform_9(%arg0: i32) -> (i32, i32) {
    %c0_i32 = arith.constant 0 : i32
    %c0_i32_0 = arith.constant 0 : i32
    %c0_i32_1 = arith.constant 0 : i32
    return %c0_i32, %c0_i32_0 : i32, i32
  }
  func.func @transform_10(%arg0: i32) -> (i32, i32) {
    %c0_i32 = arith.constant 0 : i32
    %c0_i32_0 = arith.constant 0 : i32
    %c0_i32_1 = arith.constant 0 : i32
    return %c0_i32, %c0_i32_0 : i32, i32
  }
  func.func @transform_11(%arg0: i32) -> (i32, i32) {
    %c0_i32 = arith.constant 0 : i32
    %c0_i32_0 = arith.constant 0 : i32
    %c0_i32_1 = arith.constant 0 : i32
    return %c0_i32, %c0_i32_0 : i32, i32
  }
  func.func @transform_12(%arg0: i32) -> (i32, i32) {
    %c0_i32 = arith.constant 0 : i32
    %c0_i32_0 = arith.constant 0 : i32
    %c0_i32_1 = arith.constant 0 : i32
    return %c0_i32, %c0_i32_0 : i32, i32
  }
  func.func @transform_13(%arg0: i32) -> (i32, i32) {
    %c0_i32 = arith.constant 0 : i32
    %c0_i32_0 = arith.constant 0 : i32
    %c0_i32_1 = arith.constant 0 : i32
    return %c0_i32, %c0_i32_0 : i32, i32
  }
  func.func @transform_14(%arg0: i32) -> (i32, i32) {
    %c0_i32 = arith.constant 0 : i32
    %c0_i32_0 = arith.constant 0 : i32
    %c0_i32_1 = arith.constant 0 : i32
    return %c0_i32, %c0_i32_0 : i32, i32
  }
  func.func @transform_15(%arg0: i32) -> (i32, i32) {
    %c0_i32 = arith.constant 0 : i32
    %c0_i32_0 = arith.constant 0 : i32
    %c0_i32_1 = arith.constant 0 : i32
    return %c0_i32, %c0_i32_0 : i32, i32
  }
}

module attributes {stable_mosaic.version = 11 : i64} {
  func.func @_epilogue_kernel(%arg0: i32, %arg1: memref<16x8xf32, #tpu.memory_space<vmem>>, %arg2: memref<16x8xf32, #tpu.memory_space<vmem>>, %arg3: memref<4x8xf32, #tpu.memory_space<vmem>>, %arg4: memref<4x8xf32, #tpu.memory_space<vmem>>, %arg5: memref<4x8xf32, #tpu.memory_space<vmem>>, %arg6: memref<16x4xf32, #tpu.memory_space<vmem>>, %arg7: memref<16x4xf32, #tpu.memory_space<vmem>>, %arg8: memref<16x4xf32, #tpu.memory_space<vmem>>, %arg9: memref<1x1xf32, #tpu.memory_space<vmem>>, %arg10: memref<1x1xf32, #tpu.memory_space<vmem>>) attributes {dimension_semantics = [#tpu.dimension_semantics<arbitrary>], iteration_bounds = array<i64: 1>, scalar_prefetch = 0 : i64, scratch_operands = 0 : i64, tpu.core_type = #tpu.core_type<tc>, window_params = [{transform_indices = @transform_0, window_bounds = array<i64: 16, 8>}, {transform_indices = @transform_1, window_bounds = array<i64: 16, 8>}, {pipeline_mode = #tpu.pipeline_mode<synchronous>, transform_indices = @transform_2, window_bounds = array<i64: 4, 8>}, {pipeline_mode = #tpu.pipeline_mode<synchronous>, transform_indices = @transform_3, window_bounds = array<i64: 4, 8>}, {pipeline_mode = #tpu.pipeline_mode<synchronous>, transform_indices = @transform_4, window_bounds = array<i64: 4, 8>}, {transform_indices = @transform_5, window_bounds = array<i64: 16, 4>}, {transform_indices = @transform_6, window_bounds = array<i64: 16, 4>}, {transform_indices = @transform_7, window_bounds = array<i64: 16, 4>}, {pipeline_mode = #tpu.pipeline_mode<synchronous>, transform_indices = @transform_8, window_bounds = array<i64: 1, 1>}, {pipeline_mode = #tpu.pipeline_mode<synchronous>, transform_indices = @transform_9, window_bounds = array<i64: 1, 1>}]} {
    %c0_i32 = arith.constant 0 : i32
    %0 = arith.cmpi eq, %arg0, %c0_i32 : i32
    %1 = arith.extui %0 : i1 to i32
    %c0_i32_0 = arith.constant 0 : i32
    %2 = arith.cmpi ne, %1, %c0_i32_0 : i32
    scf.if %2 {
      %cst_55 = arith.constant 0.000000e+00 : f32
      %123 = vector.broadcast %cst_55 : f32 to vector<1x1xf32>
      %c0_56 = arith.constant 0 : index
      %c0_57 = arith.constant 0 : index
      %124 = vector.load %arg9[%c0_56, %c0_57] : memref<1x1xf32, #tpu.memory_space<vmem>>, vector<1x1xf32>
      tpu.vector_store %arg9[%c0_56, %c0_57], %123 {strides = array<i32>} : memref<1x1xf32, #tpu.memory_space<vmem>>, vector<1x1xf32>,
      %cst_58 = arith.constant 0.000000e+00 : f32
      %125 = vector.broadcast %cst_58 : f32 to vector<1x1xf32>
      %c0_59 = arith.constant 0 : index
      %c0_60 = arith.constant 0 : index
      %126 = vector.load %arg10[%c0_59, %c0_60] : memref<1x1xf32, #tpu.memory_space<vmem>>, vector<1x1xf32>
      tpu.vector_store %arg10[%c0_59, %c0_60], %125 {strides = array<i32>} : memref<1x1xf32, #tpu.memory_space<vmem>>, vector<1x1xf32>,
    } else {
    }
    %c0 = arith.constant 0 : index
    %c0_1 = arith.constant 0 : index
    %3 = vector.load %arg1[%c0, %c0_1] : memref<16x8xf32, #tpu.memory_space<vmem>>, vector<16x8xf32>
    %4 = arith.mulf %3, %3 : vector<16x8xf32>
    %cst = arith.constant dense<0.000000e+00> : vector<16xf32>
    %5 = vector.multi_reduction <add>, %4, %cst [1] : vector<16x8xf32> to vector<16xf32>
    %6 = vector.shape_cast %5 : vector<16xf32> to vector<16x1xf32>
    %c0_2 = arith.constant 0 : index
    %c0_3 = arith.constant 0 : index
    %7 = vector.load %arg3[%c0_2, %c0_3] : memref<4x8xf32, #tpu.memory_space<vmem>>, vector<4x8xf32>
    %8 = arith.mulf %7, %7 : vector<4x8xf32>
    %cst_4 = arith.constant dense<0.000000e+00> : vector<4xf32>
    %9 = vector.multi_reduction <add>, %8, %cst_4 [1] : vector<4x8xf32> to vector<4xf32>
    %10 = vector.shape_cast %9 : vector<4xf32> to vector<4x1xf32>
    %cst_5 = arith.constant dense<0.000000e+00> : vector<16x4xf32>
    %11 = tpu.matmul %3, %7, %cst_5 {dimension_numbers = #tpu.dot_dimension_numbers<[1], [1], [0], [0], [0, 0, 1, 0], [], []>} : vector<16x8xf32>, vector<4x8xf32>, vector<16x4xf32> -> vector<16x4xf32>
    %12 = tpu.transpose %10, [1, 0] : vector<4x1xf32> -> vector<1x4xf32>
    %13 = vector.broadcast %6 : vector<16x1xf32> to vector<16x4xf32>
    %14 = vector.broadcast %12 : vector<1x4xf32> to vector<16x4xf32>
    %15 = arith.addf %13, %14 : vector<16x4xf32>
    %cst_6 = arith.constant 2.000000e+00 : f32
    %16 = vector.broadcast %cst_6 : f32 to vector<16x4xf32>
    %17 = arith.mulf %16, %11 : vector<16x4xf32>
    %18 = arith.subf %15, %17 : vector<16x4xf32>
    %cst_7 = arith.constant 0.000000e+00 : f32
    %19 = vector.broadcast %cst_7 : f32 to vector<16x4xf32>
    %20 = arith.maximumf %18, %19 : vector<16x4xf32>
    %cst_8 = arith.constant 1.000000e+00 : f32
    %21 = vector.broadcast %cst_8 : f32 to vector<16x4xf32>
    %22 = arith.addf %21, %20 : vector<16x4xf32>
    %23 = tpu.reciprocal %22 {approx = true} : vector<16x4xf32> -> vector<16x4xf32>
    %cst_9 = arith.constant dense<0.000000e+00> : vector<16xf32>
    %24 = vector.multi_reduction <add>, %23, %cst_9 [1] : vector<16x4xf32> to vector<16xf32>
    %25 = vector.shape_cast %24 : vector<16xf32> to vector<16x1xf32>
    %26 = tpu.reciprocal %25 {approx = true} : vector<16x1xf32> -> vector<16x1xf32>
    %27 = vector.broadcast %26 : vector<16x1xf32> to vector<16x4xf32>
    %28 = arith.mulf %23, %27 : vector<16x4xf32>
    %c0_10 = arith.constant 0 : index
    %c0_11 = arith.constant 0 : index
    %29 = vector.load %arg4[%c0_10, %c0_11] : memref<4x8xf32, #tpu.memory_space<vmem>>, vector<4x8xf32>
    %30 = arith.mulf %29, %29 : vector<4x8xf32>
    %cst_12 = arith.constant dense<0.000000e+00> : vector<4xf32>
    %31 = vector.multi_reduction <add>, %30, %cst_12 [1] : vector<4x8xf32> to vector<4xf32>
    %32 = vector.shape_cast %31 : vector<4xf32> to vector<4x1xf32>
    %cst_13 = arith.constant dense<0.000000e+00> : vector<16x4xf32>
    %33 = tpu.matmul %3, %29, %cst_13 {dimension_numbers = #tpu.dot_dimension_numbers<[1], [1], [0], [0], [0, 0, 1, 0], [], []>} : vector<16x8xf32>, vector<4x8xf32>, vector<16x4xf32> -> vector<16x4xf32>
    %34 = tpu.transpose %32, [1, 0] : vector<4x1xf32> -> vector<1x4xf32>
    %35 = vector.broadcast %6 : vector<16x1xf32> to vector<16x4xf32>
    %36 = vector.broadcast %34 : vector<1x4xf32> to vector<16x4xf32>
    %37 = arith.addf %35, %36 : vector<16x4xf32>
    %cst_14 = arith.constant 2.000000e+00 : f32
    %38 = vector.broadcast %cst_14 : f32 to vector<16x4xf32>
    %39 = arith.mulf %38, %33 : vector<16x4xf32>
    %40 = arith.subf %37, %39 : vector<16x4xf32>
    %cst_15 = arith.constant 0.000000e+00 : f32
    %41 = vector.broadcast %cst_15 : f32 to vector<16x4xf32>
    %42 = arith.maximumf %40, %41 : vector<16x4xf32>
    %cst_16 = arith.constant 1.000000e+00 : f32
    %43 = vector.broadcast %cst_16 : f32 to vector<16x4xf32>
    %44 = arith.addf %43, %42 : vector<16x4xf32>
    %45 = tpu.reciprocal %44 {approx = true} : vector<16x4xf32> -> vector<16x4xf32>
    %cst_17 = arith.constant dense<0.000000e+00> : vector<16xf32>
    %46 = vector.multi_reduction <add>, %45, %cst_17 [1] : vector<16x4xf32> to vector<16xf32>
    %47 = vector.shape_cast %46 : vector<16xf32> to vector<16x1xf32>
    %48 = tpu.reciprocal %47 {approx = true} : vector<16x1xf32> -> vector<16x1xf32>
    %49 = vector.broadcast %48 : vector<16x1xf32> to vector<16x4xf32>
    %50 = arith.mulf %45, %49 : vector<16x4xf32>
    %c0_18 = arith.constant 0 : index
    %c0_19 = arith.constant 0 : index
    %51 = vector.load %arg5[%c0_18, %c0_19] : memref<4x8xf32, #tpu.memory_space<vmem>>, vector<4x8xf32>
    %52 = arith.mulf %51, %51 : vector<4x8xf32>
    %cst_20 = arith.constant dense<0.000000e+00> : vector<4xf32>
    %53 = vector.multi_reduction <add>, %52, %cst_20 [1] : vector<4x8xf32> to vector<4xf32>
    %54 = vector.shape_cast %53 : vector<4xf32> to vector<4x1xf32>
    %cst_21 = arith.constant dense<0.000000e+00> : vector<16x4xf32>
    %55 = tpu.matmul %3, %51, %cst_21 {dimension_numbers = #tpu.dot_dimension_numbers<[1], [1], [0], [0], [0, 0, 1, 0], [], []>} : vector<16x8xf32>, vector<4x8xf32>, vector<16x4xf32> -> vector<16x4xf32>
    %56 = tpu.transpose %54, [1, 0] : vector<4x1xf32> -> vector<1x4xf32>
    %57 = vector.broadcast %6 : vector<16x1xf32> to vector<16x4xf32>
    %58 = vector.broadcast %56 : vector<1x4xf32> to vector<16x4xf32>
    %59 = arith.addf %57, %58 : vector<16x4xf32>
    %cst_22 = arith.constant 2.000000e+00 : f32
    %60 = vector.broadcast %cst_22 : f32 to vector<16x4xf32>
    %61 = arith.mulf %60, %55 : vector<16x4xf32>
    %62 = arith.subf %59, %61 : vector<16x4xf32>
    %cst_23 = arith.constant 0.000000e+00 : f32
    %63 = vector.broadcast %cst_23 : f32 to vector<16x4xf32>
    %64 = arith.maximumf %62, %63 : vector<16x4xf32>
    %cst_24 = arith.constant 1.000000e+00 : f32
    %65 = vector.broadcast %cst_24 : f32 to vector<16x4xf32>
    %66 = arith.addf %65, %64 : vector<16x4xf32>
    %67 = tpu.reciprocal %66 {approx = true} : vector<16x4xf32> -> vector<16x4xf32>
    %cst_25 = arith.constant dense<0.000000e+00> : vector<16xf32>
    %68 = vector.multi_reduction <add>, %67, %cst_25 [1] : vector<16x4xf32> to vector<16xf32>
    %69 = vector.shape_cast %68 : vector<16xf32> to vector<16x1xf32>
    %70 = tpu.reciprocal %69 {approx = true} : vector<16x1xf32> -> vector<16x1xf32>
    %71 = vector.broadcast %70 : vector<16x1xf32> to vector<16x4xf32>
    %72 = arith.mulf %67, %71 : vector<16x4xf32>
    %c0_26 = arith.constant 0 : index
    %c0_27 = arith.constant 0 : index
    %73 = vector.load %arg6[%c0_26, %c0_27] : memref<16x4xf32, #tpu.memory_space<vmem>>, vector<16x4xf32>
    tpu.vector_store %arg6[%c0_26, %c0_27], %28 {strides = array<i32>} : memref<16x4xf32, #tpu.memory_space<vmem>>, vector<16x4xf32>,
    %c0_28 = arith.constant 0 : index
    %c0_29 = arith.constant 0 : index
    %74 = vector.load %arg7[%c0_28, %c0_29] : memref<16x4xf32, #tpu.memory_space<vmem>>, vector<16x4xf32>
    tpu.vector_store %arg7[%c0_28, %c0_29], %50 {strides = array<i32>} : memref<16x4xf32, #tpu.memory_space<vmem>>, vector<16x4xf32>,
    %c0_30 = arith.constant 0 : index
    %c0_31 = arith.constant 0 : index
    %75 = vector.load %arg8[%c0_30, %c0_31] : memref<16x4xf32, #tpu.memory_space<vmem>>, vector<16x4xf32>
    tpu.vector_store %arg8[%c0_30, %c0_31], %72 {strides = array<i32>} : memref<16x4xf32, #tpu.memory_space<vmem>>, vector<16x4xf32>,
    %76 = arith.mulf %28, %28 : vector<16x4xf32>
    %cst_32 = arith.constant dense<0.000000e+00> : vector<16xf32>
    %77 = vector.multi_reduction <add>, %28, %cst_32 [1] : vector<16x4xf32> to vector<16xf32>
    %78 = vector.shape_cast %77 : vector<16xf32> to vector<16x1xf32>
    %79 = tpu.reciprocal %78 {approx = true} : vector<16x1xf32> -> vector<16x1xf32>
    %80 = vector.broadcast %79 : vector<16x1xf32> to vector<16x4xf32>
    %81 = arith.mulf %76, %80 : vector<16x4xf32>
    %cst_33 = arith.constant dense<0.000000e+00> : vector<16xf32>
    %82 = vector.multi_reduction <add>, %81, %cst_33 [1] : vector<16x4xf32> to vector<16xf32>
    %83 = vector.shape_cast %82 : vector<16xf32> to vector<16x1xf32>
    %84 = tpu.reciprocal %83 {approx = true} : vector<16x1xf32> -> vector<16x1xf32>
    %85 = vector.broadcast %84 : vector<16x1xf32> to vector<16x4xf32>
    %86 = arith.mulf %81, %85 : vector<16x4xf32>
    %87 = arith.addf %28, %50 : vector<16x4xf32>
    %88 = arith.addf %87, %72 : vector<16x4xf32>
    %cst_34 = arith.constant 0.333333343 : f32
    %89 = vector.broadcast %cst_34 : f32 to vector<16x4xf32>
    %90 = arith.mulf %88, %89 : vector<16x4xf32>
    %cst_35 = arith.constant 0.000000e+00 : f32
    %91 = vector.broadcast %cst_35 : f32 to vector<16x4xf32>
    %92 = arith.cmpf ogt, %86, %91 : vector<16x4xf32>
    %cst_36 = arith.constant 1.000000e-15 : f32
    %93 = vector.broadcast %cst_36 : f32 to vector<16x4xf32>
    %94 = arith.maximumf %86, %93 : vector<16x4xf32>
    %95 = math.log %94 : vector<16x4xf32>
    %cst_37 = arith.constant 1.000000e-15 : f32
    %96 = vector.broadcast %cst_37 : f32 to vector<16x4xf32>
    %97 = arith.maximumf %90, %96 : vector<16x4xf32>
    %98 = math.log %97 : vector<16x4xf32>
    %99 = arith.subf %95, %98 : vector<16x4xf32>
    %100 = arith.mulf %86, %99 : vector<16x4xf32>
    %cst_38 = arith.constant 0.000000e+00 : f32
    %101 = vector.broadcast %cst_38 : f32 to vector<16x4xf32>
    %102 = arith.select %92, %100, %101 : vector<16x4xi1>, vector<16x4xf32>
    %c0_39 = arith.constant 0 : index
    %c0_40 = arith.constant 0 : index
    %103 = vector.load %arg9[%c0_39, %c0_40] : memref<1x1xf32, #tpu.memory_space<vmem>>, vector<1x1xf32>
    %cst_41 = arith.constant dense<0.000000e+00> : vector<4xf32>
    %104 = vector.multi_reduction <add>, %102, %cst_41 [0] : vector<16x4xf32> to vector<4xf32>
    %105 = vector.shape_cast %104 : vector<4xf32> to vector<1x4xf32>
    %cst_42 = arith.constant dense<0.000000e+00> : vector<1xf32>
    %106 = vector.multi_reduction <add>, %105, %cst_42 [1] : vector<1x4xf32> to vector<1xf32>
    %107 = vector.shape_cast %106 : vector<1xf32> to vector<1x1xf32>
    %108 = arith.addf %103, %107 : vector<1x1xf32>
    %c0_43 = arith.constant 0 : index
    %c0_44 = arith.constant 0 : index
    %109 = vector.load %arg9[%c0_43, %c0_44] : memref<1x1xf32, #tpu.memory_space<vmem>>, vector<1x1xf32>
    tpu.vector_store %arg9[%c0_43, %c0_44], %108 {strides = array<i32>} : memref<1x1xf32, #tpu.memory_space<vmem>>, vector<1x1xf32>,
    %c0_45 = arith.constant 0 : index
    %c0_46 = arith.constant 0 : index
    %110 = vector.load %arg2[%c0_45, %c0_46] : memref<16x8xf32, #tpu.memory_space<vmem>>, vector<16x8xf32>
    %111 = arith.subf %3, %110 : vector<16x8xf32>
    %c0_47 = arith.constant 0 : index
    %c0_48 = arith.constant 0 : index
    %112 = vector.load %arg10[%c0_47, %c0_48] : memref<1x1xf32, #tpu.memory_space<vmem>>, vector<1x1xf32>
    %113 = arith.mulf %111, %111 : vector<16x8xf32>
    %cst_49 = arith.constant dense<0.000000e+00> : vector<8xf32>
    %114 = vector.multi_reduction <add>, %113, %cst_49 [0] : vector<16x8xf32> to vector<8xf32>
    %115 = vector.shape_cast %114 : vector<8xf32> to vector<1x8xf32>
    %cst_50 = arith.constant dense<0.000000e+00> : vector<1xf32>
    %116 = vector.multi_reduction <add>, %115, %cst_50 [1] : vector<1x8xf32> to vector<1xf32>
    %117 = vector.shape_cast %116 : vector<1xf32> to vector<1x1xf32>
    %118 = arith.addf %112, %117 : vector<1x1xf32>
    %c0_51 = arith.constant 0 : index
    %c0_52 = arith.constant 0 : index
    %119 = vector.load %arg10[%c0_51, %c0_52] : memref<1x1xf32, #tpu.memory_space<vmem>>, vector<1x1xf32>
    tpu.vector_store %arg10[%c0_51, %c0_52], %118 {strides = array<i32>} : memref<1x1xf32, #tpu.memory_space<vmem>>, vector<1x1xf32>,
    %c0_i32_53 = arith.constant 0 : i32
    %120 = arith.cmpi eq, %arg0, %c0_i32_53 : i32
    %121 = arith.extui %120 : i1 to i32
    %c0_i32_54 = arith.constant 0 : i32
    %122 = arith.cmpi ne, %121, %c0_i32_54 : i32
    scf.if %122 {
      %c0_55 = arith.constant 0 : index
      %c0_56 = arith.constant 0 : index
      %123 = vector.load %arg10[%c0_55, %c0_56] : memref<1x1xf32, #tpu.memory_space<vmem>>, vector<1x1xf32>
      %cst_57 = arith.constant 7.812500e-03 : f32
      %124 = vector.broadcast %cst_57 : f32 to vector<1x1xf32>
      %125 = arith.mulf %123, %124 : vector<1x1xf32>
      %c0_58 = arith.constant 0 : index
      %c0_59 = arith.constant 0 : index
      %126 = vector.load %arg10[%c0_58, %c0_59] : memref<1x1xf32, #tpu.memory_space<vmem>>, vector<1x1xf32>
      tpu.vector_store %arg10[%c0_58, %c0_59], %125 {strides = array<i32>} : memref<1x1xf32, #tpu.memory_space<vmem>>, vector<1x1xf32>,
    } else {
    }
    return
  }
  func.func @transform_0(%arg0: i32) -> (i32, i32) {
    %c0_i32 = arith.constant 0 : i32
    %c0_i32_0 = arith.constant 0 : i32
    return %arg0, %c0_i32 : i32, i32
  }
  func.func @transform_1(%arg0: i32) -> (i32, i32) {
    %c0_i32 = arith.constant 0 : i32
    %c0_i32_0 = arith.constant 0 : i32
    return %arg0, %c0_i32 : i32, i32
  }
  func.func @transform_2(%arg0: i32) -> (i32, i32) {
    %c0_i32 = arith.constant 0 : i32
    %c0_i32_0 = arith.constant 0 : i32
    %c0_i32_1 = arith.constant 0 : i32
    return %c0_i32, %c0_i32_0 : i32, i32
  }
  func.func @transform_3(%arg0: i32) -> (i32, i32) {
    %c0_i32 = arith.constant 0 : i32
    %c0_i32_0 = arith.constant 0 : i32
    %c0_i32_1 = arith.constant 0 : i32
    return %c0_i32, %c0_i32_0 : i32, i32
  }
  func.func @transform_4(%arg0: i32) -> (i32, i32) {
    %c0_i32 = arith.constant 0 : i32
    %c0_i32_0 = arith.constant 0 : i32
    %c0_i32_1 = arith.constant 0 : i32
    return %c0_i32, %c0_i32_0 : i32, i32
  }
  func.func @transform_5(%arg0: i32) -> (i32, i32) {
    %c0_i32 = arith.constant 0 : i32
    %c0_i32_0 = arith.constant 0 : i32
    return %arg0, %c0_i32 : i32, i32
  }
  func.func @transform_6(%arg0: i32) -> (i32, i32) {
    %c0_i32 = arith.constant 0 : i32
    %c0_i32_0 = arith.constant 0 : i32
    return %arg0, %c0_i32 : i32, i32
  }
  func.func @transform_7(%arg0: i32) -> (i32, i32) {
    %c0_i32 = arith.constant 0 : i32
    %c0_i32_0 = arith.constant 0 : i32
    return %arg0, %c0_i32 : i32, i32
  }
  func.func @transform_8(%arg0: i32) -> (i32, i32) {
    %c0_i32 = arith.constant 0 : i32
    %c0_i32_0 = arith.constant 0 : i32
    %c0_i32_1 = arith.constant 0 : i32
    return %c0_i32, %c0_i32_0 : i32, i32
  }
  func.func @transform_9(%arg0: i32) -> (i32, i32) {
    %c0_i32 = arith.constant 0 : i32
    %c0_i32_0 = arith.constant 0 : i32
    %c0_i32_1 = arith.constant 0 : i32
    return %c0_i32, %c0_i32_0 : i32, i32
  }
}

</mosaic_0001>

<bundles_post_ra>
// kernel: hgnn_forward.3
= control target key start
LH: loop header
LB: loop body
LE: loop exit
PB: predicated region body
PF: predicated region fallthrough
CT: control target
= control target key end

     0   :  { %vm37_vm0 = vcmask 130048   ;;  %vm56_vm1 = vcmask 64512   ;;  %vm114_vm2 = vcmask 31744   ;;  %v348_v24 = vmov 0   ;;  %s494_s1 = inlined_call_operand.vmem [shape: f32[16,8], index: 1, kind: input, shape index: {}]   ;;  %s495_s0 = inlined_call_operand.vmem [shape: f32[16,16], index: 0, kind: input, shape index: {}]   ;;  %s496_s2 = inlined_call_operand.vmem [shape: f32[8,8], index: 2, kind: input, shape index: {}]   ;;  %s497_s3 = inlined_call_operand.vmem [shape: f32[8,4], index: 3, kind: input, shape index: {}]   ;;  %s498_s4 = inlined_call_operand.vmem [shape: f32[8,4], index: 4, kind: input, shape index: {}]   ;;  %s499_s6 = inlined_call_operand.vmem [shape: f32[16,8], index: 6, kind: output, shape index: {0}]   ;;  %s500_s5 = inlined_call_operand.<no memory space> [shape: f32[1,1], index: 5, kind: input, shape index: {}]   ;;  %s501_s7 = inlined_call_operand.vmem [shape: f32[16,4], index: 7, kind: output, shape index: {1}]   ;;  %s502_s8 = inlined_call_operand.vmem [shape: f32[16,4], index: 8, kind: output, shape index: {2}]   ;;  %s503_s9 = inlined_call_operand.vmem [shape: f32[16,4], index: 9, kind: output, shape index: {3}]   ;;  %s504_s10 = inlined_call_operand.vmem [shape: f32[16,4], index: 10, kind: output, shape index: {4}]  }
   0x1   :  { %v34_v0 = vld [vmem:[%s494_s1] sm:$0xff]  ;;  %v35_v1 = vld [vmem:[%s494_s1 + $0x8] sm:$0xff]  ;;  %v16_v23 = vstv %s500_s5  ;;  %306 = vset.pattern.permute.xlu0 %v348_v24  ;;  %305 = vset.pattern.permute.xlu2 %v348_v24 }
   0x2   :  { %v31_v2 = vld [vmem:[%s495_s0] sm:$0xff]  ;;  %v36_v3 = vpack.c.bf16 %v35_v1, %v34_v0  ;;  %v32_v4 = vld [vmem:[%s495_s0 + $0x8] sm:$0xff]  ;;  %17 = vst [vmem:[#allocation2] sm:$0x1] %v16_v23 }
   0x3   :  { %v33_v5 = vpack.c.bf16 %v32_v4, %v31_v2  ;;  %v55_v6 = vld [vmem:[%s496_s2] sm:$0xff] }
   0x4   :  { %48 = vmatpush.bf16.msra.mxu0 %v36_v3  ;;  %v90_v7 = vld [vmem:[%s497_s3] sm:$0xff]  ;;  %78 = vmatpush.msra.mxu1 %v55_v6 }
   0x5   :  { %v137_v8 = vld [vmem:[%s498_s4] sm:$0xff]  ;;  %106 = vmatpush.msra.mxu2 %v90_v7 }
   0x6   :  { %153 = vmatpush.msra.mxu3 %v137_v8 }
   0x7   :  { %297 = vmatmul.msk.bf16.vlgmr.msra.gmra.mxu0 %vm37_vm0, %v33_v5 }
   0x9   :  { %v183_v45 = vld [vmem:[#allocation2] sm:$0x1] }
   0xa   :  { %v192_v46 = vsub.f32 1.0, %v183_v45  ;;  %v307_v48 = vld [vmem:[#allocation2] ss:$0 sm:$0xff] }
   0xc   :  { %v194_v47 = vperm.slane %v192_v46, 0 }
  0x84   :  { %v50_v9 = vpop.f32.mrf.mxu0 }
  0x85   :  { %298 = vmatmul.msk.f32.vlgmr.msra.gmra.mxu1 %vm56_vm1, %v50_v9  ;;  %300 = vmatmul.msk.f32.vlgmr.msra.gmra.mxu2 %vm56_vm1, %v50_v9 }
  0x86   :  { %302 = vmatmul.msk.f32.vlgmr.msra.gmra.mxu3 %vm56_vm1, %v50_v9 }
  0x8c   :  { %v52_v10 = vpop.f32.mrf.mxu0 }
  0x8d   :  { %299 = vmatmul.msk.f32.gmra.mxu1 %vm56_vm1, %v52_v10  ;;  %301 = vmatmul.msk.f32.gmra.mxu2 %vm56_vm1, %v52_v10 }
  0x8e   :  { %303 = vmatmul.msk.f32.gmra.mxu3 %vm56_vm1, %v52_v10 }
 0x102   :  { %v80_v11 = vpop.f32.mrf.mxu1 }
 0x103   :  { %v86_v12 = vmax.f32 %v80_v11, 0.0 }
 0x105   :  { %88 = vst.msk [vmem:[%s499_s6] sm:$0xff] %vm56_vm1, %v86_v12 }
 0x108   :  { %v108_v13 = vpop.f32.mrf.mxu2 }
 0x109   :  { %v155_v14 = vpop.f32.mrf.mxu3  ;;  %v115_v15 = vsel %vm114_vm2, %v108_v13, -inf }
 0x10a   :  { %v161_v16 = vsel %vm114_vm2, %v155_v14, -inf  ;;  %116 = vmax.xlane.f32.xlu0 %v115_v15  ;;  %v83_v17 = vpop.f32.mrf.mxu1 }
 0x10b   :  { %162 = vmax.xlane.f32.xlu1 %v161_v16  ;;  %v87_v18 = vmax.f32 %v83_v17, 0.0 }
 0x10d   :  { %89 = vst.msk [vmem:[%s499_s6 + $0x8] sm:$0xff] %vm56_vm1, %v87_v18 }
 0x110   :  { %v111_v19 = vpop.f32.mrf.mxu2 }
 0x111   :  { %v158_v20 = vpop.f32.mrf.mxu3  ;;  %v118_v21 = vsel %vm114_vm2, %v111_v19, -inf }
 0x112   :  { %v164_v22 = vsel %vm114_vm2, %v158_v20, -inf  ;;  %119 = vmax.xlane.f32.xlu0 %v118_v21 }
 0x113   :  { %165 = vmax.xlane.f32.xlu1 %v164_v22 }
 0x17d   :  { %v117_v25 = vpop.xlane.xlu0 %116 }
 0x17e   :  { %v163_v26 = vpop.xlane.xlu1 %162  ;;  %v121_v27 = vsub.f32 %v108_v13, %v117_v25 }
 0x17f   :  { %v167_v28 = vsub.f32 %v155_v14, %v163_v26 }
 0x180   :  { %v123_v29 = vmul.f32 1.442695, %v121_v27 }
 0x181   :  { %v169_v30 = vmul.f32 1.442695, %v167_v28 }
 0x182   :  { %308 = vpow2.f32 %v123_v29 }
 0x183   :  { %310 = vpow2.f32 %v169_v30 }
 0x185   :  { %v120_v31 = vpop.xlane.xlu0 %119 }
 0x186   :  { %v166_v32 = vpop.xlane.xlu1 %165  ;;  %v122_v33 = vsub.f32 %v111_v19, %v120_v31 }
 0x187   :  { %v168_v34 = vsub.f32 %v158_v20, %v166_v32 }
 0x188   :  { %v309_v35 = vpop.eup %308  ;;  %v125_v36 = vmul.f32 1.442695, %v122_v33 }
 0x189   :  { %v311_v37 = vpop.eup %310  ;;  %v171_v38 = vmul.f32 1.442695, %v168_v34  ;;  %v127_v39 = vsel %vm114_vm2, %v309_v35, 0.0 }
 0x18a   :  { %312 = vpow2.f32 %v125_v36  ;;  %128 = vadd.xlane.f32.xlu2 %v127_v39  ;;  %v173_v40 = vsel %vm114_vm2, %v311_v37, 0.0 }
 0x18b   :  { %314 = vpow2.f32 %v171_v38  ;;  %174 = vadd.xlane.f32.xlu0 %v173_v40 }
 0x190   :  { %v313_v41 = vpop.eup %312 }
 0x191   :  { %v315_v42 = vpop.eup %314  ;;  %v130_v43 = vsel %vm114_vm2, %v313_v41, 0.0 }
 0x192   :  { %v176_v44 = vsel %vm114_vm2, %v315_v42, 0.0  ;;  %131 = vadd.xlane.f32.xlu2 %v130_v43 }
 0x193   :  { %177 = vadd.xlane.f32.xlu1 %v176_v44 }
 0x19f   :  { %196 = vperm.xlu0 %306, %v194_v47  }
 0x1aa   :  { %187 = vperm.xlu2 %305, %v307_v48  }
 0x1fd   :  { %v129_v49 = vpop.xlane.xlu2 %128 }
 0x1fe   :  { %316 = vrcp.f32 %v129_v49  ;;  %v175_v50 = vpop.xlane.xlu0 %174 }
 0x1ff   :  { %318 = vrcp.f32 %v175_v50 }
 0x204   :  { %v317_v51 = vpop.eup %316 }
 0x205   :  { %v132_v52 = vpop.xlane.xlu2 %131  ;;  %v135_v53 = vmul.f32 %v317_v51, %v309_v35  ;;  %v319_v56 = vpop.eup %318 }
 0x206   :  { %v178_v54 = vpop.xlane.xlu1 %177  ;;  %320 = vrcp.f32 %v132_v52  ;;  %v181_v57 = vmul.f32 %v319_v56, %v311_v37 }
 0x207   :  { %322 = vrcp.f32 %v178_v54  ;;  %v205_v55 = vsel %vm114_vm2, %v135_v53, -inf }
 0x208   :  { %206 = vmax.xlane.f32.xlu1 %v205_v55  ;;  %v229_v63 = vsel %vm114_vm2, %v181_v57, -inf }
 0x20c   :  { %v321_v58 = vpop.eup %320 }
 0x20d   :  { %v323_v59 = vpop.eup %322  ;;  %v136_v60 = vmul.f32 %v321_v58, %v313_v41  ;;  %v188_v62 = vpop.permute.xlu2 %187 }
 0x20e   :  { %v182_v61 = vmul.f32 %v323_v59, %v315_v42  ;;  %v190_v2 = vmul.f32 %v188_v62, %v135_v53 }
 0x20f   :  { %v191_v3 = vmul.f32 %v188_v62, %v136_v60  ;;  %v208_v8 = vsel %vm114_vm2, %v136_v60, -inf }
 0x210   :  { %v232_v0 = vsel %vm114_vm2, %v182_v61, -inf  ;;  %230 = vmax.xlane.f32.xlu1 %v229_v63 }
 0x211   :  { %233 = vmax.xlane.f32.xlu2 %v232_v0  ;;  %v197_v1 = vpop.permute.xlu0 %196 }
 0x212   :  { %v199_v4 = vmul.f32 %v197_v1, %v181_v57  ;;  %v200_v5 = vmul.f32 %v197_v1, %v182_v61 }
 0x214   :  { %v201_v6 = vadd.f32 %v199_v4, %v190_v2  ;;  %v202_v7 = vadd.f32 %v200_v5, %v191_v3 }
 0x216   :  { %203 = vst.msk [vmem:[%s501_s7] sm:$0xff] %vm114_vm2, %v201_v6  ;;  %v253_v9 = vsel %vm114_vm2, %v201_v6, -inf  ;;  %v256_v10 = vsel %vm114_vm2, %v202_v7, -inf }
 0x217   :  { %204 = vst.msk [vmem:[%s501_s7 + $0x8] sm:$0xff] %vm114_vm2, %v202_v7 }
 0x218   :  { %209 = vmax.xlane.f32.xlu1 %v208_v8 }
 0x220   :  { %254 = vmax.xlane.f32.xlu1 %v253_v9 }
 0x228   :  { %257 = vmax.xlane.f32.xlu1 %v256_v10 }
 0x27b   :  { %v207_v11 = vpop.xlane.xlu1 %206 }
 0x27c   :  { %v211_v12 = vsub.f32 %v135_v53, %v207_v11 }
 0x27e   :  { %v213_v13 = vmul.f32 1.442695, %v211_v12 }
 0x280   :  { %324 = vpow2.f32 %v213_v13 }
 0x283   :  { %v231_v14 = vpop.xlane.xlu1 %230 }
 0x284   :  { %v235_v15 = vsub.f32 %v181_v57, %v231_v14  ;;  %v234_v19 = vpop.xlane.xlu2 %233 }
 0x285   :  { %v236_v23 = vsub.f32 %v182_v61, %v234_v19 }
 0x286   :  { %v325_v16 = vpop.eup %324  ;;  %v237_v17 = vmul.f32 1.442695, %v235_v15 }
 0x287   :  { %v217_v18 = vsel %vm114_vm2, %v325_v16, 0.0  ;;  %v239_v26 = vmul.f32 1.442695, %v236_v23 }
 0x288   :  { %326 = vpow2.f32 %v237_v17  ;;  %218 = vadd.xlane.f32.xlu0 %v217_v18 }
 0x28b   :  { %v210_v20 = vpop.xlane.xlu1 %209 }
 0x28c   :  { %v212_v21 = vsub.f32 %v136_v60, %v210_v20 }
 0x28e   :  { %v327_v22 = vpop.eup %326  ;;  %v215_v24 = vmul.f32 1.442695, %v212_v21 }
 0x28f   :  { %v241_v25 = vsel %vm114_vm2, %v327_v22, 0.0 }
 0x290   :  { %328 = vpow2.f32 %v215_v24  ;;  %242 = vadd.xlane.f32.xlu1 %v241_v25 }
 0x291   :  { %330 = vpow2.f32 %v239_v26 }
 0x293   :  { %v255_v27 = vpop.xlane.xlu1 %254 }
 0x294   :  { %v259_v28 = vsub.f32 %v201_v6, %v255_v27 }
 0x296   :  { %v329_v29 = vpop.eup %328  ;;  %v261_v30 = vmul.f32 1.442695, %v259_v28 }
 0x297   :  { %v220_v31 = vsel %vm114_vm2, %v329_v29, 0.0  ;;  %v331_v33 = vpop.eup %330 }
 0x298   :  { %332 = vpow2.f32 %v261_v30  ;;  %221 = vadd.xlane.f32.xlu1 %v220_v31  ;;  %v244_v37 = vsel %vm114_vm2, %v331_v33, 0.0 }
 0x29b   :  { %v258_v32 = vpop.xlane.xlu1 %257 }
 0x29c   :  { %v260_v34 = vsub.f32 %v202_v7, %v258_v32 }
 0x29e   :  { %v333_v35 = vpop.eup %332  ;;  %v263_v36 = vmul.f32 1.442695, %v260_v34 }
 0x29f   :  { %v265_v38 = vsel %vm114_vm2, %v333_v35, 0.0 }
 0x2a0   :  { %334 = vpow2.f32 %v263_v36  ;;  %245 = vadd.xlane.f32.xlu1 %v244_v37  ;;  %266 = vadd.xlane.f32.xlu2 %v265_v38 }
 0x2a6   :  { %v335_v39 = vpop.eup %334 }
 0x2a7   :  { %v268_v40 = vsel %vm114_vm2, %v335_v39, 0.0 }
 0x2a8   :  { %269 = vadd.xlane.f32.xlu1 %v268_v40 }
 0x2fb   :  { %v219_v41 = vpop.xlane.xlu0 %218 }
 0x2fc   :  { %336 = vrcp.f32 %v219_v41 }
 0x302   :  { %v337_v42 = vpop.eup %336 }
 0x303   :  { %v225_v43 = vmul.f32 %v337_v42, %v325_v16  ;;  %v243_v44 = vpop.xlane.xlu1 %242 }
 0x304   :  { %338 = vrcp.f32 %v243_v44 }
 0x305   :  { %227 = vst.msk [vmem:[%s502_s8] sm:$0xff] %vm114_vm2, %v225_v43 }
 0x30a   :  { %v339_v45 = vpop.eup %338 }
 0x30b   :  { %v249_v46 = vmul.f32 %v339_v45, %v327_v22  ;;  %v222_v47 = vpop.xlane.xlu1 %221 }
 0x30c   :  { %340 = vrcp.f32 %v222_v47 }
 0x30d   :  { %251 = vst.msk [vmem:[%s503_s9] sm:$0xff] %vm114_vm2, %v249_v46 }
 0x312   :  { %v341_v48 = vpop.eup %340 }
 0x313   :  { %v226_v49 = vmul.f32 %v341_v48, %v329_v29  ;;  %v267_v50 = vpop.xlane.xlu2 %266  ;;  %v246_v51 = vpop.xlane.xlu1 %245 }
 0x314   :  { %342 = vrcp.f32 %v267_v50 }
 0x315   :  { %228 = vst.msk [vmem:[%s502_s8 + $0x8] sm:$0xff] %vm114_vm2, %v226_v49  ;;  %344 = vrcp.f32 %v246_v51 }
 0x31a   :  { %v343_v52 = vpop.eup %342 }
 0x31b   :  { %v345_v53 = vpop.eup %344  ;;  %v273_v54 = vmul.f32 %v343_v52, %v333_v35  ;;  %v270_v55 = vpop.xlane.xlu1 %269 }
 0x31c   :  { %v250_v56 = vmul.f32 %v345_v53, %v331_v33  ;;  %346 = vrcp.f32 %v270_v55 }
 0x31d   :  { %275 = vst.msk [vmem:[%s504_s10] sm:$0xff] %vm114_vm2, %v273_v54 }
 0x31e   :  { %252 = vst.msk [vmem:[%s503_s9 + $0x8] sm:$0xff] %vm114_vm2, %v250_v56 }
 0x322   :  { %v347_v57 = vpop.eup %346 }
 0x323   :  { %v274_v58 = vmul.f32 %v347_v57, %v335_v39 }
 0x325   :  { %276 = vst.msk [vmem:[%s504_s10 + $0x8] sm:$0xff] %vm114_vm2, %v274_v58 }

// kernel: hgnn_forward.5
= control target key start
LH: loop header
LB: loop body
LE: loop exit
PB: predicated region body
PF: predicated region fallthrough
CT: control target
= control target key end

     0   :  { %15 = vsyncpa [#allocation3], 0  ;;  %vm47_vm0 = vcmask 60416   ;;  %vm38_vm1 = vcmask 64512   ;;  %s732_s0 = inlined_call_operand.vmem [shape: f32[16,8], index: 0, kind: input, shape index: {}]   ;;  %s733_s1 = inlined_call_operand.vmem [shape: f32[16,8], index: 1, kind: input, shape index: {}]   ;;  %s734_s2 = inlined_call_operand.vmem [shape: f32[4,8], index: 2, kind: input, shape index: {}]   ;;  %s735_s3 = inlined_call_operand.vmem [shape: f32[4,8], index: 3, kind: input, shape index: {}]   ;;  %s736_s4 = inlined_call_operand.vmem [shape: f32[4,8], index: 4, kind: input, shape index: {}]   ;;  %s737_s5 = inlined_call_operand.vmem [shape: f32[16,4], index: 5, kind: output, shape index: {0}]   ;;  %s738_s6 = inlined_call_operand.vmem [shape: f32[16,4], index: 6, kind: output, shape index: {1}]   ;;  %s739_s7 = inlined_call_operand.vmem [shape: f32[16,4], index: 7, kind: output, shape index: {2}]   ;;  %s740_s8 = inlined_call_operand.hbm [shape: f32[1,1], index: 8, kind: output, shape index: {3}]   ;;  %s741_s9 = inlined_call_operand.hbm [shape: f32[1,1], index: 9, kind: output, shape index: {4}]  }
   0x1   :  { %v45_v0 = vld [vmem:[%s734_s2] sm:$0xf]  ;;  %v616_v1 = vld [vmem:[%s732_s0 + $0x8] sm:$0xff] }
   0x2   :  { %v46_v2 = vmul.f32 %v45_v0, %v45_v0  ;;  %v37_v3 = vmul.f32 %v616_v1, %v616_v1  ;;  %461 = vmatpush.xpose.msk.msra.mxu3 %vm38_vm1, %v45_v0  ;;  %452 = vmatpush.xpose.msk.msra.mxu0 %vm38_vm1, %v45_v0 }
   0x3   :  { %16 = vsyncpa [#allocation5], 0  ;;  %v629_v6 = vld [vmem:[%s732_s0] sm:$0xff]  ;;  %vm128_vm2 = vcmask 31744   ;;  %vm31_vm5 = vcmask 0   ;;  %s432_s10 = sshll.u32 %s741_s9, 4  ;;  %s433_s10 = int_to_ptr.hbm [resolvable:$true] %s432_s10 }
   0x4   :  { %v48_v4 = vsel %vm47_vm0, %v46_v2, 0.0  ;;  %v42_v5 = vsel %vm38_vm1, %v37_v3, 0.0  ;;  %v36_v7 = vmul.f32 %v629_v6, %v629_v6  ;;  %v225_v10 = vld [vmem:[%s736_s4] sm:$0xf]  ;;  %s559_s11 = smov [#allocation2]   ;;  %s421_s14 = sshll.u32 %s740_s8, 4  ;;  %s422_s14 = int_to_ptr.hbm [resolvable:$true] %s421_s14 }
   0x5   :  { %49 = vadd.xlane.f32.xlu0 %v48_v4  ;;  %43 = vadd.xlane.f32.xlu1 %v42_v5  ;;  %v226_v11 = vmul.f32 %v225_v10, %v225_v10  ;;  %v139_v14 = vld [vmem:[%s735_s3] sm:$0xf]  ;;  %s419_s12 = sshll.u32 %s559_s11, 4  ;;  %s420_s12 = int_to_ptr.vmem [resolvable:$true] %s419_s12 }
   0x6   :  { %454 = vmatmul.msk.f32.vlgmr.msra.gmra.mxu3 %vm38_vm1, %v616_v1  ;;  %453 = vmatmul.msk.f32.vlgmr.msra.gmra.mxu0 %vm38_vm1, %v629_v6  ;;  %v39_v8 = vsel %vm38_vm1, %v36_v7, 0.0  ;;  %v140_v15 = vmul.f32 %v139_v14, %v139_v14 }
   0x7   :  { %458 = vmatpush.xpose.msk.msra.mxu2 %vm38_vm1, %v225_v10  ;;  %v227_v12 = vsel %vm47_vm0, %v226_v11, 0.0  ;;  %455 = vmatpush.xpose.msk.msra.mxu1 %vm38_vm1, %v139_v14 }
   0x8   :  { %228 = vadd.xlane.f32.xlu2 %v227_v12  ;;  %v141_v18 = vsel %vm47_vm0, %v140_v15, 0.0 }
   0xa   :  { %459 = vmatmul.msk.f32.vlgmr.msra.gmra.mxu2 %vm38_vm1, %v629_v6  ;;  %456 = vmatmul.msk.f32.vlgmr.msra.gmra.mxu1 %vm38_vm1, %v629_v6 }
   0xd   :  { %40 = vadd.xlane.f32.xlu0 %v39_v8 }
  0x12   :  { %460 = vmatmul.msk.f32.gmra.mxu2 %vm38_vm1, %v616_v1  ;;  %457 = vmatmul.msk.f32.gmra.mxu1 %vm38_vm1, %v616_v1 }
  0x15   :  { %142 = vadd.xlane.f32.xlu0 %v141_v18 }
  0x78   :  { %v50_v9 = vpop.xlane.xlu0 %49  ;;  %v645_v13 = vpop.xlane.xlu1 %43 }
  0x79   :  { %83 = vxpose.xlu1.b32.start.end [1/1] (short) (narrow) %v50_v9, 8 }
  0x7b   :  { %v229_v36 = vpop.xlane.xlu2 %228 }
  0x80   :  { %v41_v20 = vpop.xlane.xlu0 %40 }
  0x83   :  { %v77_v16 = vpop.f32.mrf.mxu0 }
  0x84   :  { %v118_v22 = vmul.f32 2.0, %v77_v16 }
  0x87   :  { %v164_v47 = vpop.f32.mrf.mxu1 }
  0x88   :  { %v143_v45 = vpop.xlane.xlu0 %142  ;;  %v205_v55 = vmul.f32 2.0, %v164_v47 }
  0x89   :  { %v80_v17 = vpop.f32.mrf.mxu3 }
  0x8a   :  { %v119_v23 = vmul.f32 2.0, %v80_v17 }
  0x8d   :  { %v250_v46 = vpop.f32.mrf.mxu2 }
  0x8e   :  { %v291_v51 = vmul.f32 2.0, %v250_v46 }
  0x8f   :  { %v167_v54 = vpop.f32.mrf.mxu1 }
  0x90   :  { %v206_v61 = vmul.f32 2.0, %v167_v54 }
  0x95   :  { %v253_v53 = vpop.f32.mrf.mxu2 }
  0x96   :  { %v292_v59 = vmul.f32 2.0, %v253_v53 }
 0x11d   :  { %v99_v19 = vpop.trf.xlu1 }
 0x11e   :  { %v115_v21 = vperm.slane %v99_v19, 0 }
 0x120   :  { %v117_v24 = vadd.f32 %v115_v21, %v645_v13  ;;  %v116_v25 = vadd.f32 %v115_v21, %v41_v20 }
 0x122   :  { %v120_v26 = vsub.f32 %v116_v25, %v118_v22  ;;  %v121_v27 = vsub.f32 %v117_v24, %v119_v23 }
 0x124   :  { %v122_v28 = vmax.f32 %v120_v26, 0.0  ;;  %v123_v30 = vmax.f32 %v121_v27, 0.0 }
 0x126   :  { %v124_v29 = vadd.f32 1.0, %v122_v28  ;;  %v125_v31 = vadd.f32 1.0, %v123_v30 }
 0x128   :  { %465 = vrcp.f32 %v124_v29 }
 0x129   :  { %467 = vrcp.f32 %v125_v31 }
 0x12e   :  { %v466_v32 = vpop.eup %465 }
 0x12f   :  { %v129_v33 = vsel %vm128_vm2, %v466_v32, 0.0  ;;  %v468_v34 = vpop.eup %467 }
 0x130   :  { %130 = vadd.xlane.f32.xlu2 %v129_v33  ;;  %v132_v35 = vsel %vm128_vm2, %v468_v34, 0.0 }
 0x138   :  { %133 = vadd.xlane.f32.xlu2 %v132_v35  ;;  %v382_v35 = vld [vmem:[%s733_s1 + $0x8] sm:$0xff] }
 0x1a3   :  { %v131_v37 = vpop.xlane.xlu2 %130 }
 0x1a4   :  { %469 = vrcp.f32 %v131_v37 }
 0x1aa   :  { %v470_v38 = vpop.eup %469 }
 0x1ab   :  { %v659_v39 = vmul.f32 %v470_v38, %v466_v32  ;;  %v134_v40 = vpop.xlane.xlu2 %133  ;;  %v384_v38 = vsub.f32 %v616_v1, %v382_v35 }
 0x1ac   :  { %471 = vrcp.f32 %v134_v40 }
 0x1ad   :  { %311 = vst.msk [vmem:[%s737_s5] sm:$0xff] %vm128_vm2, %v659_v39  ;;  %v319_v41 = vsel %vm128_vm2, %v659_v39, 0.0  ;;  %v317_v23 = vmul.f32 %v659_v39, %v659_v39 }
 0x1ae   :  { %320 = vadd.xlane.f32.xlu0 %v319_v41 }
 0x1b2   :  { %v472_v42 = vpop.eup %471 }
 0x1b3   :  { %v668_v43 = vmul.f32 %v472_v42, %v468_v34  ;;  %v381_v34 = vld [vmem:[%s733_s1] sm:$0xff]  ;;  %v387_v42 = vmul.f32 %v384_v38, %v384_v38 }
 0x1b4   :  { %v383_v37 = vsub.f32 %v629_v6, %v381_v34  ;;  %v557_v34 = vmov 0.0  }
 0x1b5   :  { %312 = vst.msk [vmem:[%s737_s5 + $0x8] sm:$0xff] %vm128_vm2, %v668_v43  ;;  %v322_v44 = vsel %vm128_vm2, %v668_v43, 0.0  ;;  %v318_v27 = vmul.f32 %v668_v43, %v668_v43 }
 0x1b6   :  { %323 = vadd.xlane.f32.xlu2 %v322_v44  ;;  %v386_v41 = vmul.f32 %v383_v37, %v383_v37  ;;  %33 = vst.msk [vmem:[#allocation4] sm:$0x1] %vm31_vm5, %v557_v34 }
 0x1b7   :  { %32 = vst.msk [vmem:[#allocation2] sm:$0x1] %vm31_vm5, %v557_v34 }
 0x1bd   :  { %v385_v35 = vld [vmem:[#allocation4] sm:$0x1] }
 0x1d7   :  { %170 = vxpose.xlu0.b32.start.end [1/1] (short) (narrow) %v143_v45, 8 }
 0x1df   :  { %256 = vxpose.xlu2.b32.start.end [1/1] (short) (narrow) %v229_v36, 8 }
 0x221   :  { %v321_v49 = vpop.xlane.xlu0 %320 }
 0x229   :  { %v324_v48 = vpop.xlane.xlu2 %323 }
 0x278   :  { %v272_v50 = vpop.trf.xlu2 }
 0x279   :  { %v288_v52 = vperm.slane %v272_v50, 0 }
 0x27b   :  { %v289_v56 = vadd.f32 %v288_v52, %v41_v20  ;;  %v186_v57 = vpop.trf.xlu0  ;;  %v290_v58 = vadd.f32 %v288_v52, %v645_v13 }
 0x27c   :  { %v202_v60 = vperm.slane %v186_v57, 0 }
 0x27d   :  { %v293_v62 = vsub.f32 %v289_v56, %v291_v51  ;;  %v294_v3 = vsub.f32 %v290_v58, %v292_v59 }
 0x27e   :  { %v203_v63 = vadd.f32 %v202_v60, %v41_v20  ;;  %v204_v0 = vadd.f32 %v202_v60, %v645_v13 }
 0x27f   :  { %v295_v2 = vmax.f32 %v293_v62, 0.0  ;;  %v296_v10 = vmax.f32 %v294_v3, 0.0 }
 0x280   :  { %v207_v4 = vsub.f32 %v203_v63, %v205_v55  ;;  %v208_v5 = vsub.f32 %v204_v0, %v206_v61 }
 0x281   :  { %v297_v7 = vadd.f32 1.0, %v295_v2  ;;  %v298_v14 = vadd.f32 1.0, %v296_v10 }
 0x282   :  { %v209_v8 = vmax.f32 %v207_v4, 0.0  ;;  %v210_v9 = vmax.f32 %v208_v5, 0.0 }
 0x283   :  { %473 = vrcp.f32 %v297_v7 }
 0x284   :  { %v211_v11 = vadd.f32 1.0, %v209_v8  ;;  %v212_v12 = vadd.f32 1.0, %v210_v9 }
 0x286   :  { %475 = vrcp.f32 %v211_v11 }
 0x287   :  { %477 = vrcp.f32 %v212_v12 }
 0x288   :  { %479 = vrcp.f32 %v298_v14 }
 0x289   :  { %v474_v15 = vpop.eup %473  ;;  %481 = vrcp.f32 %v321_v49  ;;  %v389_v49 = vsel %vm38_vm1, %v387_v42, 0.0 }
 0x28a   :  { %v301_v16 = vsel %vm128_vm2, %v474_v15, 0.0  ;;  %483 = vrcp.f32 %v324_v48  ;;  %v388_v48 = vsel %vm38_vm1, %v386_v41, 0.0  ;;  %v365_v41 = vld [vmem:[#allocation2] sm:$0x1] }
 0x28b   :  { %302 = vadd.xlane.f32.xlu2 %v301_v16  ;;  %v390_v1 = vadd.f32 %v389_v49, %v388_v48 }
 0x28c   :  { %v476_v17 = vpop.eup %475 }
 0x28d   :  { %v478_v13 = vpop.eup %477  ;;  %v215_v18 = vsel %vm128_vm2, %v476_v17, 0.0  ;;  %v391_v50 = vrot.slane %v390_v1, 4 }
 0x28e   :  { %v218_v19 = vsel %vm128_vm2, %v478_v13, 0.0  ;;  %216 = vadd.xlane.f32.xlu1 %v215_v18  ;;  %v480_v20 = vpop.eup %479 }
 0x28f   :  { %219 = vadd.xlane.f32.xlu0 %v218_v19  ;;  %v304_v21 = vsel %vm128_vm2, %v480_v20, 0.0  ;;  %v482_v22 = vpop.eup %481  ;;  %v392_v51 = vadd.f32 %v391_v50, %v390_v1 }
 0x290   :  { %v327_v24 = vmul.f32 %v482_v22, %v317_v23  ;;  %v484_v26 = vpop.eup %483 }
 0x291   :  { %v328_v28 = vmul.f32 %v484_v26, %v318_v27  ;;  %v393_v56 = vrot.slane %v392_v51, 2 }
 0x292   :  { %v329_v25 = vsel %vm128_vm2, %v327_v24, 0.0 }
 0x293   :  { %v332_v29 = vsel %vm128_vm2, %v328_v28, 0.0  ;;  %v394_v57 = vadd.f32 %v393_v56, %v392_v51 }
 0x295   :  { %v395_v60 = vrot.slane %v394_v57, 1 }
 0x296   :  { %305 = vadd.xlane.f32.xlu1 %v304_v21 }
 0x29e   :  { %330 = vadd.xlane.f32.xlu1 %v329_v25 }
 0x2a6   :  { %333 = vadd.xlane.f32.xlu1 %v332_v29 }
 0x2fe   :  { %v303_v30 = vpop.xlane.xlu2 %302 }
 0x2ff   :  { %485 = vrcp.f32 %v303_v30 }
 0x301   :  { %v217_v31 = vpop.xlane.xlu1 %216 }
 0x302   :  { %v220_v32 = vpop.xlane.xlu0 %219  ;;  %487 = vrcp.f32 %v217_v31 }
 0x303   :  { %489 = vrcp.f32 %v220_v32 }
 0x305   :  { %v486_v33 = vpop.eup %485 }
 0x306   :  { %v309_v36 = vmul.f32 %v486_v33, %v474_v15 }
 0x308   :  { %v488_v40 = vpop.eup %487  ;;  %315 = vst.msk [vmem:[%s739_s7] sm:$0xff] %vm128_vm2, %v309_v36 }
 0x309   :  { %v490_v44 = vpop.eup %489  ;;  %v223_v45 = vmul.f32 %v488_v40, %v476_v17  ;;  %v306_v46 = vpop.xlane.xlu1 %305 }
 0x30a   :  { %v224_v47 = vmul.f32 %v490_v44, %v478_v13  ;;  %491 = vrcp.f32 %v306_v46 }
 0x30b   :  { %313 = vst.msk [vmem:[%s738_s6] sm:$0xff] %vm128_vm2, %v223_v45  ;;  %v339_v6 = vadd.f32 %v223_v45, %v659_v39  ;;  %v396_v39 = vadd.f32 %v395_v60, %v394_v57 }
 0x30c   :  { %314 = vst.msk [vmem:[%s738_s6 + $0x8] sm:$0xff] %vm128_vm2, %v224_v47  ;;  %v340_v59 = vadd.f32 %v224_v47, %v668_v43  ;;  %s558_s6 = smov [#allocation4]  }
 0x30d   :  { %v341_v53 = vadd.f32 %v339_v6, %v309_v36  ;;  %v397_v3 = vsel %vm38_vm1, %v396_v39, 0.0 }
 0x30e   :  { %398 = vadd.xlane.f32.xlu0 %v397_v3 }
 0x30f   :  { %v343_v58 = vmul.f32 0.33333334, %v341_v53 }
 0x310   :  { %v492_v52 = vpop.eup %491 }
 0x311   :  { %v310_v54 = vmul.f32 %v492_v52, %v480_v20  ;;  %v331_v55 = vpop.xlane.xlu1 %330  ;;  %v353_v63 = vmax.f32 %v343_v58, 1e-15 }
 0x312   :  { %493 = vrcp.f32 %v331_v55 }
 0x313   :  { %316 = vst.msk [vmem:[%s739_s7 + $0x8] sm:$0xff] %vm128_vm2, %v310_v54  ;;  %v342_v61 = vadd.f32 %v340_v59, %v310_v54  ;;  %s430_s7 = sshll.u32 %s558_s6, 4  ;;  %s431_s7 = int_to_ptr.vmem [resolvable:$true] %s430_s7 }
 0x315   :  { %v344_v4 = vmul.f32 0.33333334, %v342_v61 }
 0x317   :  { %v354_v7 = vmax.f32 %v344_v4, 1e-15 }
 0x318   :  { %v494_v62 = vpop.eup %493 }
 0x319   :  { %v337_v0 = vmul.f32 %v494_v62, %v327_v24  ;;  %v334_v2 = vpop.xlane.xlu1 %333 }
 0x31a   :  { %495 = vrcp.f32 %v334_v2 }
 0x31b   :  { %v347_v5 = vmax.f32 %v337_v0, 1e-15  ;;  %497 = vlog2.f32 %v353_v63  ;;  %vm345_vm3 = vcmp.gt.f32.partialorder %v337_v0, 0.0 }
 0x31d   :  { %499 = vlog2.f32 %v347_v5 }
 0x31e   :  { %501 = vlog2.f32 %v354_v7 }
 0x320   :  { %v496_v8 = vpop.eup %495 }
 0x321   :  { %v338_v9 = vmul.f32 %v496_v8, %v328_v28  ;;  %v498_v10 = vpop.eup %497 }
 0x322   :  { %v356_v14 = vmul.f32 0.6931472, %v498_v10 }
 0x323   :  { %v500_v43 = vpop.eup %499  ;;  %v348_v11 = vmax.f32 %v338_v9, 1e-15  ;;  %vm346_vm4 = vcmp.gt.f32.partialorder %v338_v9, 0.0 }
 0x324   :  { %v350_v12 = vmul.f32 0.6931472, %v500_v43  ;;  %v502_v16 = vpop.eup %501 }
 0x325   :  { %503 = vlog2.f32 %v348_v11  ;;  %v358_v13 = vmul.f32 0.6931472, %v502_v16 }
 0x326   :  { %v359_v15 = vsub.f32 %v350_v12, %v356_v14 }
 0x328   :  { %v361_v18 = vmul.f32 %v359_v15, %v337_v0 }
 0x32a   :  { %v363_v22 = vsel %vm345_vm3, %v361_v18, 0.0 }
 0x32b   :  { %v504_v17 = vpop.eup %503  ;;  %v366_v24 = vsel %vm128_vm2, %v363_v22, 0.0 }
 0x32c   :  { %v352_v19 = vmul.f32 0.6931472, %v504_v17 }
 0x32e   :  { %v360_v20 = vsub.f32 %v352_v19, %v358_v13 }
 0x330   :  { %v362_v21 = vmul.f32 %v360_v20, %v338_v9 }
 0x332   :  { %v364_v23 = vsel %vm346_vm4, %v362_v21, 0.0 }
 0x333   :  { %v367_v25 = vsel %vm128_vm2, %v364_v23, 0.0 }
 0x334   :  { %v368_v26 = vadd.f32 %v367_v25, %v366_v24 }
 0x336   :  { %v369_v27 = vrot.slane %v368_v26, 4 }
 0x338   :  { %v370_v28 = vadd.f32 %v369_v27, %v368_v26 }
 0x33a   :  { %v371_v29 = vrot.slane %v370_v28, 2 }
 0x33c   :  { %v372_v30 = vadd.f32 %v371_v29, %v370_v28 }
 0x33e   :  { %v373_v31 = vrot.slane %v372_v30, 1 }
 0x340   :  { %v374_v32 = vadd.f32 %v373_v31, %v372_v30 }
 0x342   :  { %v375_v33 = vsel %vm128_vm2, %v374_v32, 0.0 }
 0x343   :  { %376 = vadd.xlane.f32.xlu1 %v375_v33 }
 0x381   :  { %v399_v36 = vpop.xlane.xlu0 %398 }
 0x382   :  { %v400_v37 = vadd.f32 %v399_v36, %v385_v35 }
 0x384   :  { %401 = vst.msk [vmem:[#allocation4] sm:$0x1] %vm31_vm5, %v400_v37 }
 0x38b   :  { %v405_v38 = vld [vmem:[#allocation4] sm:$0x1] }
 0x38c   :  { %v406_v40 = vmul.f32 0.0078125, %v405_v38 }
 0x38e   :  { %407 = vst.msk [vmem:[#allocation4] sm:$0x1] %vm31_vm5, %v406_v40 }
 0x38f   :  { %435 = dma.vmem_to_hbm [thread:$0]  %s431_s7, 16, %s433_s10, [#allocation5]  }
 0x3b6   :  { %v377_v42 = vpop.xlane.xlu1 %376 }
 0x3b7   :  { %v378_v44 = vadd.f32 %v377_v42, %v365_v41 }
 0x3b9   :  { %380 = vst.msk [vmem:[#allocation2] sm:$0x1] %vm31_vm5, %v378_v44 }
 0x3ba   :  { %424 = dma.vmem_to_hbm [thread:$0]  %s420_s12, 16, %s422_s14, [#allocation3]  }
 0x3bb   :  { %553 = dma.done.wait [#allocation3], 16  }
 0x3bc   :  { %554 = vsyncadd [#allocation3], 4294967280 }
 0x3bd   :  { %555 = dma.done.wait [#allocation5], 16  }
 0x3be   :  { %556 = vsyncadd [#allocation5], 4294967280 }
 0x3bf   :  { %450 = vsyncpa [#allocation3], 1 }
 0x3c0   :  { %451 = vsyncpa [#allocation5], 1 }

// kernel: hgnn_forward.4
= control target key start
LH: loop header
LB: loop body
LE: loop exit
PB: predicated region body
PF: predicated region fallthrough
CT: control target
= control target key end

     0   :  { %21 = vsyncpa [#allocation7], 0  ;;  %s1311_s0 = inlined_call_operand.vmem [shape: f32[16,16], index: 0, kind: input, shape index: {}]   ;;  %s1312_s1 = inlined_call_operand.vmem [shape: f32[16,8], index: 1, kind: input, shape index: {}]   ;;  %s1313_s2 = inlined_call_operand.vmem [shape: f32[8,8], index: 2, kind: input, shape index: {}]   ;;  %s1314_s3 = inlined_call_operand.vmem [shape: f32[16,4], index: 3, kind: input, shape index: {}]   ;;  %s1315_s4 = inlined_call_operand.vmem [shape: f32[16,4], index: 4, kind: input, shape index: {}]   ;;  %s1316_s5 = inlined_call_operand.vmem [shape: f32[16,4], index: 5, kind: input, shape index: {}]   ;;  %s1317_s6 = inlined_call_operand.vmem [shape: f32[4,4], index: 6, kind: input, shape index: {}]   ;;  %s1318_s7 = inlined_call_operand.vmem [shape: f32[16,8], index: 7, kind: output, shape index: {0}]   ;;  %s1319_s8 = inlined_call_operand.vmem [shape: f32[4,8], index: 8, kind: output, shape index: {1}]   ;;  %s1320_s9 = inlined_call_operand.vmem [shape: f32[4,8], index: 9, kind: output, shape index: {2}]   ;;  %s1321_s10 = inlined_call_operand.vmem [shape: f32[4,8], index: 10, kind: output, shape index: {3}]   ;;  %s1322_s11 = inlined_call_operand.hbm [shape: f32[4,4], index: 11, kind: output, shape index: {4}]   ;;  %s1323_s12 = inlined_call_operand.hbm [shape: f32[4,4], index: 12, kind: output, shape index: {5}]   ;;  %s1324_s13 = inlined_call_operand.hbm [shape: f32[4,4], index: 13, kind: output, shape index: {6}]   ;;  %s1325_s14 = inlined_call_operand.hbm [shape: f32[1,1], index: 14, kind: output, shape index: {7}]   ;;  %s1326_s15 = inlined_call_operand.hbm [shape: f32[1,1], index: 15, kind: output, shape index: {8}]  }
   0x1   :  { %22 = vsyncpa [#allocation9], 0  ;;  %v1089_v0 = vld [vmem:[%s1314_s3] sm:$0xff]  ;;  %v61_v2 = vld [vmem:[%s1312_s1 + $0x8] sm:$0xff]  ;;  %vm63_vm0 = vcmask 130048  }
   0x2   :  { %v60_v1 = vld [vmem:[%s1312_s1] sm:$0xff]  ;;  %137 = vxpose.xlu0.b32.start [1/2] (short) (narrow) %v1089_v0, 8  ;;  %v1106_v5 = vld [vmem:[%s1311_s0 + $0x8] sm:$0xff] }
   0x3   :  { %v62_v3 = vpack.c.bf16 %v61_v2, %v60_v1  ;;  %v1101_v4 = vld [vmem:[%s1311_s0] sm:$0xff]  ;;  %209 = vmatpush.msra.mxu3 %v1106_v5  ;;  %v1127_v9 = vld [vmem:[%s1314_s3 + $0x8] sm:$0xff] }
   0x4   :  { %v59_v6 = vpack.c.bf16 %v1106_v5, %v1101_v4  ;;  %v1113_v7 = vld [vmem:[%s1315_s4] sm:$0xff] }
   0x5   :  { %74 = vmatpush.bf16.msra.mxu0 %v62_v3  ;;  %297 = vxpose.xlu1.b32.start [1/2] (short) (narrow) %v1113_v7, 8  ;;  %v1120_v8 = vld [vmem:[%s1316_s5] sm:$0xff] }
   0x6   :  { %454 = vxpose.xlu2.b32.start [1/2] (short) (narrow) %v1120_v8, 8  ;;  %210 = vmatpush.msra.mxu3 %v1101_v4 }
   0x9   :  { %368 = vmatpush.msrb.mxu0 %v1106_v5 }
   0xa   :  { %23 = vsyncpa [#allocation12], 0  ;;  %835 = vmatmul.msk.bf16.vlgmr.msra.gmra.mxu0 %vm63_vm0, %v59_v6  ;;  %259 = vmatpush.msrb.mxu3 %v1127_v9  ;;  %v1136_v10 = vld [vmem:[%s1315_s4 + $0x8] sm:$0xff]  ;;  %v81_v12 = vld [vmem:[%s1313_s2] sm:$0xff]  ;;  %vm82_vm1 = vcmask 64512   ;;  %v268_v25 = vsub.f32 0.0, %v1089_v0 }
   0xb   :  { %369 = vmatpush.msrb.mxu0 %v1101_v4  ;;  %138 = vxpose.xlu0.b32.end [2/2] (short) (narrow) %v1127_v9, 8  ;;  %v1144_v11 = vld [vmem:[%s1316_s5 + $0x8] sm:$0xff]  ;;  %v270_v18 = vadd.f32 1e-15, %v1089_v0  ;;  %v271_v19 = vadd.f32 1e-15, %v1127_v9 }
   0xc   :  { %260 = vmatpush.msrb.mxu3 %v1089_v0  ;;  %104 = vmatpush.msra.mxu1 %v81_v12  ;;  %v585_v20 = vadd.f32 1e-15, %v1120_v8  ;;  %v586_v21 = vadd.f32 1e-15, %v1144_v11  ;;  %v269_v27 = vsub.f32 0.0, %v1127_v9  ;;  %vm47_vm2 = vcmask 27648  }
   0xd   :  { %525 = vmatpush.msra.mxu0 %v1106_v5  ;;  %298 = vxpose.xlu1.b32.end [2/2] (short) (narrow) %v1136_v10, 8  ;;  %856 = vlog2.f32 %v270_v18  ;;  %v428_v29 = vadd.f32 1e-15, %v1113_v7  ;;  %v429_v30 = vadd.f32 1e-15, %v1136_v10  ;;  %v583_v36 = vsub.f32 0.0, %v1120_v8 }
   0xe   :  { %455 = vxpose.xlu2.b32.end [2/2] (short) (narrow) %v1144_v11, 8  ;;  %858 = vlog2.f32 %v271_v19  ;;  %v584_v38 = vsub.f32 0.0, %v1144_v11  ;;  %v1000_v39 = vmov 0.0   ;;  %vm278_vm3 = vcmask 31744   ;;  %s767_s2 = sshll.u32 %s1323_s12, 4  ;;  %s1001_s5 = smov [#allocation8]   ;;  %s768_s2 = int_to_ptr.hbm [resolvable:$true] %s767_s2 }
   0xf   :  { %526 = vmatpush.msra.mxu0 %v1101_v4  ;;  %860 = vlog2.f32 %v585_v20  ;;  %53 = vst.msk [vmem:[#allocation2] sm:$0xf] %vm47_vm2, %v1000_v39  ;;  %v426_v50 = vsub.f32 0.0, %v1113_v7  ;;  %v427_v51 = vsub.f32 0.0, %v1136_v10  ;;  %vm43_vm4 = vcmask 60416   ;;  %s765_s21 = sshll.u32 %s1001_s5, 4  ;;  %s766_s21 = int_to_ptr.vmem [resolvable:$true] %s765_s21 }
  0x10   :  { %862 = vlog2.f32 %v586_v21  ;;  %48 = vst.msk [vmem:[#allocation6] sm:$0xf] %vm47_vm2, %v1000_v39  ;;  %vm51_vm5 = vcmask 0   ;;  %s756_s23 = sshll.u32 %s1322_s11, 4  ;;  %s1002_s24 = smov [#allocation6]   ;;  %s757_s23 = int_to_ptr.hbm [resolvable:$true] %s756_s23 }
  0x11   :  { %864 = vlog2.f32 %v428_v29  ;;  %49 = vst.msk [vmem:[#allocation8] sm:$0xf] %vm47_vm2, %v1000_v39  ;;  %s754_s25 = sshll.u32 %s1002_s24, 4  ;;  %s1003_s12 = smov [#allocation10]   ;;  %s755_s25 = int_to_ptr.vmem [resolvable:$true] %s754_s25 }
  0x12   :  { %866 = vlog2.f32 %v429_v30  ;;  %50 = vst.msk [vmem:[#allocation10] sm:$0xf] %vm47_vm2, %v1000_v39  ;;  %s776_s26 = sshll.u32 %s1003_s12, 4  ;;  %s778_s29 = sshll.u32 %s1324_s13, 4  ;;  %s777_s26 = int_to_ptr.vmem [resolvable:$true] %s776_s26  ;;  %s779_s29 = int_to_ptr.hbm [resolvable:$true] %s778_s29 }
  0x13   :  { %v857_v22 = vpop.eup %856  ;;  %54 = vst.msk [vmem:[#allocation3] sm:$0xf] %vm47_vm2, %v1000_v39  ;;  %s1004_s11 = smov [#allocation11]   ;;  %s789_s0 = sshll.u32 %s1325_s14, 4  ;;  %s790_s0 = int_to_ptr.hbm [resolvable:$true] %s789_s0 }
  0x14   :  { %v859_v23 = vpop.eup %858  ;;  %v273_v26 = vmul.f32 0.6931472, %v857_v22  ;;  %55 = vst.msk [vmem:[#allocation4] sm:$0xf] %vm47_vm2, %v1000_v39  ;;  %s787_s13 = sshll.u32 %s1004_s11, 4  ;;  %s1005_s16 = smov [#allocation13]   ;;  %s788_s13 = int_to_ptr.vmem [resolvable:$true] %s787_s13 }
  0x15   :  { %v275_v28 = vmul.f32 0.6931472, %v859_v23  ;;  %v861_v31 = vpop.eup %860  ;;  %45 = vst.msk [vmem:[%s1320_s9] sm:$0xf] %vm43_vm4, %v1000_v39  ;;  %s798_s17 = sshll.u32 %s1005_s16, 4  ;;  %s800_s3 = sshll.u32 %s1326_s15, 4  ;;  %s799_s17 = int_to_ptr.vmem [resolvable:$true] %s798_s17  ;;  %s801_s3 = int_to_ptr.hbm [resolvable:$true] %s800_s3 }
  0x16   :  { %v276_v32 = vmul.f32 %v273_v26, %v268_v25  ;;  %v863_v34 = vpop.eup %862  ;;  %v588_v37 = vmul.f32 0.6931472, %v861_v31  ;;  %v244_v23 = vld [vmem:[#allocation2] sm:$0xf]  ;;  %44 = vst.msk [vmem:[%s1319_s8] sm:$0xf] %vm43_vm4, %v1000_v39 }
  0x17   :  { %v277_v33 = vmul.f32 %v275_v28, %v269_v27  ;;  %v590_v40 = vmul.f32 0.6931472, %v863_v34  ;;  %v865_v45 = vpop.eup %864  ;;  %46 = vst.msk [vmem:[%s1321_s10] sm:$0xf] %vm43_vm4, %v1000_v39 }
  0x18   :  { %v279_v41 = vsel %vm278_vm3, %v276_v32, 0.0  ;;  %v591_v46 = vmul.f32 %v588_v37, %v583_v36  ;;  %v867_v48 = vpop.eup %866  ;;  %v431_v53 = vmul.f32 0.6931472, %v865_v45  ;;  %52 = vst.msk [vmem:[#allocation13] sm:$0x1] %vm51_vm5, %v1000_v39 }
  0x19   :  { %v280_v42 = vsel %vm278_vm3, %v277_v33, 0.0  ;;  %v592_v47 = vmul.f32 %v590_v40, %v584_v38  ;;  %v433_v54 = vmul.f32 0.6931472, %v867_v48  ;;  %56 = vst.msk [vmem:[#allocation5] sm:$0x1] %vm51_vm5, %v1000_v39 }
  0x1a   :  { %v281_v43 = vadd.f32 %v280_v42, %v279_v41  ;;  %v593_v55 = vsel %vm278_vm3, %v591_v46, 0.0  ;;  %v434_v61 = vmul.f32 %v431_v53, %v426_v50 }
  0x1b   :  { %v594_v56 = vsel %vm278_vm3, %v592_v47, 0.0  ;;  %v435_v62 = vmul.f32 %v433_v54, %v427_v51  ;;  %v559_v31 = vld [vmem:[#allocation4] sm:$0xf] }
  0x1c   :  { %v282_v44 = vrot.slane %v281_v43, 4  ;;  %v595_v58 = vadd.f32 %v594_v56, %v593_v55  ;;  %v436_v3 = vsel %vm278_vm3, %v434_v61, 0.0  ;;  %v115_v56 = vmul.f32 %v1101_v4, %v1101_v4 }
  0x1d   :  { %v437_v6 = vsel %vm278_vm3, %v435_v62, 0.0  ;;  %v136_v55 = vld [vmem:[%s1319_s8] sm:$0xf] }
  0x1e   :  { %v283_v49 = vadd.f32 %v282_v44, %v281_v43  ;;  %v596_v60 = vrot.slane %v595_v58, 4 }
  0x20   :  { %v284_v52 = vrot.slane %v283_v49, 2 }
  0x22   :  { %v285_v57 = vadd.f32 %v284_v52, %v283_v49  ;;  %v296_v52 = vld [vmem:[%s1320_s9] sm:$0xf] }
  0x24   :  { %v286_v59 = vrot.slane %v285_v57, 1 }
  0x26   :  { %v287_v63 = vadd.f32 %v286_v59, %v285_v57  ;;  %v116_v57 = vmul.f32 %v1106_v5, %v1106_v5  ;;  %v453_v59 = vld [vmem:[%s1321_s10] sm:$0xf] }
  0x28   :  { %v288_v1 = vsel %vm278_vm3, %v287_v63, 0.0  ;;  %v118_v61 = vsel %vm63_vm0, %v116_v57, 0.0 }
  0x6d   :  { %289 = vadd.xlane.f32.xlu1 %v288_v1 }
  0x87   :  { %v76_v13 = vpop.f32.mrf.mxu0 }
  0x88   :  { %836 = vmatmul.msk.f32.vlgmr.msra.gmra.mxu1 %vm82_vm1, %v76_v13 }
  0x8f   :  { %v78_v14 = vpop.f32.mrf.mxu0 }
  0x90   :  { %837 = vmatmul.msk.f32.gmra.mxu1 %vm82_vm1, %v78_v14 }
  0x9f   :  { %v1158_v17 = vpop.trf.xlu2 }
  0xa7   :  { %v153_v15 = vpop.trf.xlu0 }
  0xa8   :  { %839 = vmatmul.msk.f32.vlgmr.msra.gmra.mxu3 %vm63_vm0, %v153_v15 }
  0xa9   :  { %v313_v16 = vpop.trf.xlu1  ;;  %417 = vmatpush.msra.mxu3 %v1136_v10 }
  0xaa   :  { %843 = vmatmul.msk.f32.vlgmr.msrb.gmra.mxu0 %vm63_vm0, %v313_v16 }
  0xab   :  { %418 = vmatpush.msra.mxu3 %v1113_v7 }
  0xb0   :  { %841 = vmatmul.msk.f32.vlgmr.msrb.gmra.mxu3 %vm63_vm0, %v153_v15 }
  0xb1   :  { %574 = vmatpush.msrb.mxu3 %v1144_v11 }
  0xb2   :  { %847 = vmatmul.msk.f32.vlgmr.msra.gmra.mxu0 %vm63_vm0, %v1158_v17 }
  0xb3   :  { %575 = vmatpush.msrb.mxu3 %v1120_v8 }
  0xb8   :  { %845 = vmatmul.msk.f32.vlgmr.msra.gmra.mxu3 %vm63_vm0, %v313_v16 }
  0xc0   :  { %849 = vmatmul.msk.f32.vlgmr.msrb.gmra.mxu3 %vm63_vm0, %v1158_v17 }
 0x105   :  { %v106_v24 = vpop.f32.mrf.mxu1 }
 0x106   :  { %112 = vst.msk [vmem:[%s1318_s7] sm:$0xff] %vm82_vm1, %v106_v24 }
 0x10d   :  { %v109_v35 = vpop.f32.mrf.mxu1 }
 0x10e   :  { %113 = vst.msk [vmem:[%s1318_s7 + $0x8] sm:$0xff] %vm82_vm1, %v109_v35  ;;  %186 = vmatpush.msra.mxu2 %v109_v35  ;;  %346 = vmatpush.msrb.mxu1 %v109_v35 }
 0x110   :  { %187 = vmatpush.msra.mxu2 %v106_v24  ;;  %347 = vmatpush.msrb.mxu1 %v106_v24 }
 0x111   :  { %838 = vmatmul.msk.f32.vlgmr.msra.gmra.mxu2 %vm63_vm0, %v153_v15  ;;  %842 = vmatmul.msk.f32.vlgmr.msrb.gmra.mxu1 %vm63_vm0, %v313_v16 }
 0x112   :  { %503 = vmatpush.msra.mxu1 %v109_v35  ;;  %235 = vmatpush.msrb.mxu2 %v1127_v9  ;;  %v438_v9 = vadd.f32 %v437_v6, %v436_v3  ;;  %v290_v3 = vpop.xlane.xlu1 %289  ;;  %v267_v6 = vld [vmem:[#allocation13] sm:$0x1] }
 0x114   :  { %504 = vmatpush.msra.mxu1 %v106_v24  ;;  %236 = vmatpush.msrb.mxu2 %v1089_v0  ;;  %v597_v0 = vadd.f32 %v596_v60, %v595_v58  ;;  %v439_v12 = vrot.slane %v438_v9, 4  ;;  %v117_v60 = vsel %vm63_vm0, %v115_v56, 0.0 }
 0x115   :  { %v119_v63 = vadd.f32 %v118_v61, %v117_v60 }
 0x116   :  { %394 = vmatpush.msra.mxu2 %v1136_v10  ;;  %v598_v2 = vrot.slane %v597_v0, 2  ;;  %v440_v14 = vadd.f32 %v439_v12, %v438_v9 }
 0x117   :  { %v120_v5 = vrot.slane %v119_v63, 4 }
 0x118   :  { %395 = vmatpush.msra.mxu2 %v1113_v7  ;;  %v599_v7 = vadd.f32 %v598_v2, %v597_v0  ;;  %v441_v16 = vrot.slane %v440_v14, 2 }
 0x119   :  { %846 = vmatmul.msk.f32.vlgmr.msra.gmra.mxu1 %vm63_vm0, %v1158_v17  ;;  %v121_v1 = vadd.f32 %v120_v5, %v119_v63 }
 0x11a   :  { %v600_v10 = vrot.slane %v599_v7, 1  ;;  %v442_v17 = vadd.f32 %v441_v16, %v440_v14  ;;  %v215_v16 = vld [vmem:[#allocation6] sm:$0xf] }
 0x11b   :  { %v122_v2 = vrot.slane %v121_v1, 2 }
 0x11c   :  { %v601_v13 = vadd.f32 %v600_v10, %v599_v7  ;;  %v443_v18 = vrot.slane %v442_v17, 1  ;;  %v291_v7 = vadd.f32 %v290_v3, %v267_v6 }
 0x11d   :  { %v123_v9 = vadd.f32 %v122_v2, %v121_v1  ;;  %v114_v2 = vld [vmem:[#allocation5] sm:$0x1] }
 0x11e   :  { %v602_v15 = vsel %vm278_vm3, %v601_v13, 0.0  ;;  %v444_v20 = vadd.f32 %v443_v18, %v442_v17  ;;  %292 = vst.msk [vmem:[#allocation13] sm:$0x1] %vm51_vm5, %v291_v7 }
 0x11f   :  { %603 = vadd.xlane.f32.xlu1 %v602_v15  ;;  %v124_v39 = vrot.slane %v123_v9, 1 }
 0x120   :  { %v445_v21 = vsel %vm278_vm3, %v444_v20, 0.0 }
 0x121   :  { %446 = vadd.xlane.f32.xlu2 %v445_v21  ;;  %v125_v10 = vadd.f32 %v124_v39, %v123_v9 }
 0x123   :  { %v126_v12 = vsel %vm63_vm0, %v125_v10, 0.0 }
 0x124   :  { %127 = vadd.xlane.f32.xlu0 %v126_v12 }
 0x125   :  { %v425_v14 = vld [vmem:[#allocation13] sm:$0x1] }
 0x127   :  { %v371_v22 = vpop.f32.mrf.mxu0 }
 0x12b   :  { %v212_v19 = vpop.f32.mrf.mxu3 }
 0x12c   :  { %840 = vmatmul.msk.f32.vlgmr.msrb.gmra.mxu2 %vm63_vm0, %v212_v19 }
 0x12d   :  { %551 = vmatpush.msrb.mxu2 %v1144_v11 }
 0x12f   :  { %552 = vmatpush.msrb.mxu2 %v1120_v8  ;;  %v402_v8 = vld [vmem:[#allocation3] sm:$0xf]  ;;  %v528_v11 = vpop.f32.mrf.mxu0 }
 0x133   :  { %v262_v24 = vpop.f32.mrf.mxu3 }
 0x134   :  { %v265_v25 = vadd.f32 %v262_v24, %v244_v23  ;;  %844 = vmatmul.msk.f32.vlgmr.msra.gmra.mxu2 %vm63_vm0, %v371_v22  ;;  %v374_v22 = vld [vmem:[#allocation8] sm:$0xf]  ;;  %v610_v24 = vld [vmem:[%s1317_s6] sm:$0xf] }
 0x136   :  { %266 = vst.msk [vmem:[#allocation2] sm:$0xf] %vm47_vm2, %v265_v25 }
 0x13b   :  { %v420_v26 = vpop.f32.mrf.mxu3 }
 0x13c   :  { %v423_v27 = vadd.f32 %v420_v26, %v402_v8  ;;  %848 = vmatmul.msk.f32.vlgmr.msrb.gmra.mxu2 %vm63_vm0, %v528_v11 }
 0x13d   :  { %v623_v28 = vld [vmem:[#allocation2] sm:$0xf] }
 0x13e   :  { %424 = vst.msk [vmem:[#allocation3] sm:$0xf] %vm47_vm2, %v423_v27  ;;  %v627_v29 = vmul.f32 %v623_v28, %v623_v28 }
 0x140   :  { %v628_v30 = vsel %vm47_vm2, %v627_v29, 0.0  ;;  %v531_v29 = vld [vmem:[#allocation10] sm:$0xf] }
 0x141   :  { %v629_v32 = vrot.slane %v628_v30, 4 }
 0x143   :  { %v577_v33 = vpop.f32.mrf.mxu3  ;;  %v630_v34 = vadd.f32 %v629_v32, %v628_v30 }
 0x144   :  { %v580_v35 = vadd.f32 %v577_v33, %v559_v31 }
 0x145   :  { %v631_v36 = vrot.slane %v630_v34, 2  ;;  %v665_v37 = vld [vmem:[#allocation3] sm:$0xf] }
 0x146   :  { %581 = vst.msk [vmem:[#allocation4] sm:$0xf] %vm47_vm2, %v580_v35  ;;  %v668_v38 = vmul.f32 %v665_v37, %v665_v37 }
 0x147   :  { %v632_v40 = vadd.f32 %v631_v36, %v630_v34 }
 0x148   :  { %v669_v41 = vsel %vm47_vm2, %v668_v38, 0.0 }
 0x149   :  { %v633_v42 = vrot.slane %v632_v40, 1  ;;  %v670_v43 = vrot.slane %v669_v41, 4 }
 0x14b   :  { %v634_v44 = vadd.f32 %v633_v42, %v632_v40  ;;  %v671_v45 = vadd.f32 %v670_v43, %v669_v41 }
 0x14d   :  { %v635_v46 = vsel %vm278_vm3, %v634_v44, 0.0  ;;  %v672_v47 = vrot.slane %v671_v45, 2  ;;  %v707_v25 = vld [vmem:[#allocation4] sm:$0xf] }
 0x14e   :  { %636 = vadd.xlane.f32.xlu1 %v635_v46  ;;  %v710_v27 = vmul.f32 %v707_v25, %v707_v25 }
 0x14f   :  { %v673_v48 = vadd.f32 %v672_v47, %v671_v45 }
 0x150   :  { %v711_v31 = vsel %vm47_vm2, %v710_v27, 0.0 }
 0x151   :  { %v674_v49 = vrot.slane %v673_v48, 1  ;;  %v712_v37 = vrot.slane %v711_v31, 4 }
 0x153   :  { %v675_v50 = vadd.f32 %v674_v49, %v673_v48  ;;  %v713_v44 = vadd.f32 %v712_v37, %v711_v31 }
 0x155   :  { %v676_v51 = vsel %vm278_vm3, %v675_v50, 0.0  ;;  %v714_v49 = vrot.slane %v713_v44, 2 }
 0x156   :  { %677 = vadd.xlane.f32.xlu2 %v676_v51 }
 0x18e   :  { %v349_v53 = vpop.f32.mrf.mxu1 }
 0x18f   :  { %v352_v54 = vadd.f32 %v349_v53, %v296_v52 }
 0x191   :  { %353 = vst.msk [vmem:[%s1320_s9] sm:$0xf] %vm43_vm4, %v352_v54 }
 0x192   :  { %v604_v17 = vpop.xlane.xlu1 %603 }
 0x194   :  { %v189_v58 = vpop.f32.mrf.mxu2  ;;  %v447_v13 = vpop.xlane.xlu2 %446 }
 0x195   :  { %v192_v62 = vadd.f32 %v189_v58, %v136_v55  ;;  %v448_v15 = vadd.f32 %v447_v13, %v425_v14  ;;  %v715_v55 = vadd.f32 %v714_v49, %v713_v44 }
 0x196   :  { %v506_v0 = vpop.f32.mrf.mxu1 }
 0x197   :  { %194 = vst.msk [vmem:[%s1319_s8] sm:$0xf] %vm43_vm4, %v192_v62  ;;  %v509_v4 = vadd.f32 %v506_v0, %v453_v59  ;;  %v716_v60 = vrot.slane %v715_v55, 1  ;;  %v128_v3 = vpop.xlane.xlu0 %127 }
 0x198   :  { %449 = vst.msk [vmem:[#allocation13] sm:$0x1] %vm51_vm5, %v448_v15  ;;  %v129_v6 = vadd.f32 %v128_v3, %v114_v2 }
 0x199   :  { %510 = vst.msk [vmem:[%s1321_s10] sm:$0xf] %vm43_vm4, %v509_v4  ;;  %v717_v63 = vadd.f32 %v716_v60, %v715_v55 }
 0x19a   :  { %131 = vst.msk [vmem:[#allocation5] sm:$0x1] %vm51_vm5, %v129_v6 }
 0x19b   :  { %v718_v5 = vsel %vm278_vm3, %v717_v63, 0.0 }
 0x19f   :  { %v582_v18 = vld [vmem:[#allocation13] sm:$0x1] }
 0x1a0   :  { %v605_v20 = vadd.f32 %v604_v17, %v582_v18 }
 0x1a1   :  { %v624_v10 = vld [vmem:[#allocation5] sm:$0x1] }
 0x1a2   :  { %606 = vst.msk [vmem:[#allocation13] sm:$0x1] %vm51_vm5, %v605_v20 }
 0x1a9   :  { %v738_v7 = vld [vmem:[#allocation13] sm:$0x1] }
 0x1aa   :  { %v739_v9 = vmul.f32 0.0625, %v738_v7 }
 0x1ac   :  { %740 = vst.msk [vmem:[#allocation13] sm:$0x1] %vm51_vm5, %v739_v9 }
 0x1af   :  { %v238_v19 = vpop.f32.mrf.mxu2 }
 0x1b0   :  { %v241_v21 = vadd.f32 %v238_v19, %v215_v16 }
 0x1b2   :  { %243 = vst.msk [vmem:[#allocation6] sm:$0xf] %vm47_vm2, %v241_v21 }
 0x1b3   :  { %759 = dma.vmem_to_hbm [thread:$0]  %s755_s25, 64, %s757_s23, [#allocation7]  }
 0x1b7   :  { %v397_v23 = vpop.f32.mrf.mxu2 }
 0x1b8   :  { %v400_v8 = vadd.f32 %v397_v23, %v374_v22 }
 0x1b9   :  { %v611_v11 = vld [vmem:[#allocation6] sm:$0xf] }
 0x1ba   :  { %401 = vst.msk [vmem:[#allocation8] sm:$0xf] %vm47_vm2, %v400_v8  ;;  %v612_v26 = vmul.f32 %v611_v11, %v610_v24 }
 0x1bb   :  { %770 = dma.vmem_to_hbm [thread:$0]  %s766_s21, 64, %s768_s2, [#allocation9]  }
 0x1bc   :  { %v613_v28 = vsel %vm47_vm2, %v612_v26, 0.0 }
 0x1bd   :  { %v614_v30 = vrot.slane %v613_v28, 4 }
 0x1bf   :  { %v554_v32 = vpop.f32.mrf.mxu2  ;;  %v615_v33 = vadd.f32 %v614_v30, %v613_v28 }
 0x1c0   :  { %v557_v34 = vadd.f32 %v554_v32, %v531_v29 }
 0x1c1   :  { %v616_v35 = vrot.slane %v615_v33, 2  ;;  %v653_v36 = vld [vmem:[#allocation8] sm:$0xf]  ;;  %v637_v39 = vpop.xlane.xlu1 %636 }
 0x1c2   :  { %558 = vst.msk [vmem:[#allocation10] sm:$0xf] %vm47_vm2, %v557_v34  ;;  %v654_v38 = vmul.f32 %v653_v36, %v610_v24 }
 0x1c3   :  { %v617_v40 = vadd.f32 %v616_v35, %v615_v33  ;;  %781 = dma.vmem_to_hbm [thread:$0]  %s777_s26, 64, %s779_s29, [#allocation9]  }
 0x1c4   :  { %v655_v41 = vsel %vm47_vm2, %v654_v38, 0.0 }
 0x1c5   :  { %v618_v42 = vrot.slane %v617_v40, 1  ;;  %v656_v43 = vrot.slane %v655_v41, 4 }
 0x1c7   :  { %v619_v45 = vadd.f32 %v618_v42, %v617_v40  ;;  %v657_v46 = vadd.f32 %v656_v43, %v655_v41 }
 0x1c9   :  { %v620_v47 = vsel %vm278_vm3, %v619_v45, 0.0  ;;  %v658_v48 = vrot.slane %v657_v46, 2  ;;  %v695_v50 = vld [vmem:[#allocation10] sm:$0xf]  ;;  %v678_v20 = vpop.xlane.xlu2 %677 }
 0x1ca   :  { %621 = vadd.xlane.f32.xlu1 %v620_v47  ;;  %v696_v51 = vmul.f32 %v695_v50, %v610_v24 }
 0x1cb   :  { %v659_v52 = vadd.f32 %v658_v48, %v657_v46 }
 0x1cc   :  { %v697_v53 = vsel %vm47_vm2, %v696_v51, 0.0 }
 0x1cd   :  { %v660_v54 = vrot.slane %v659_v52, 1  ;;  %v698_v56 = vrot.slane %v697_v53, 4 }
 0x1cf   :  { %v661_v57 = vadd.f32 %v660_v54, %v659_v52  ;;  %v699_v58 = vadd.f32 %v698_v56, %v697_v53 }
 0x1d1   :  { %v662_v59 = vsel %vm278_vm3, %v661_v57, 0.0  ;;  %v700_v61 = vrot.slane %v699_v58, 2 }
 0x1d2   :  { %663 = vadd.xlane.f32.xlu0 %v662_v59 }
 0x1d3   :  { %v701_v62 = vadd.f32 %v700_v61, %v699_v58 }
 0x1d5   :  { %v702_v0 = vrot.slane %v701_v62, 1 }
 0x1d7   :  { %v703_v4 = vadd.f32 %v702_v0, %v701_v62 }
 0x1d9   :  { %v704_v1 = vsel %vm278_vm3, %v703_v4, 0.0 }
 0x1da   :  { %719 = vadd.xlane.f32.xlu0 %v718_v5  ;;  %705 = vadd.xlane.f32.xlu1 %v704_v1 }
 0x23d   :  { %v622_v12 = vpop.xlane.xlu1 %621 }
 0x23e   :  { %v625_v13 = vmul.f32 2.0, %v622_v12 }
 0x240   :  { %v626_v14 = vsub.f32 %v624_v10, %v625_v13 }
 0x242   :  { %v638_v15 = vadd.f32 %v637_v39, %v626_v14 }
 0x244   :  { %v639_v16 = vmax.f32 %v638_v15, 0.0 }
 0x245   :  { %v664_v17 = vpop.xlane.xlu0 %663 }
 0x246   :  { %868 = vrsqrt.f32 %v639_v16  ;;  %v666_v18 = vmul.f32 2.0, %v664_v17  ;;  %vm647_vm7 = vcmp.eq.f32.partialorder %v639_v16, inf  ;;  %v650_v50 = vand.u32 2147483648, %v639_v16 }
 0x247   :  { %vm649_vm9 = vcmp.eq.f32.partialorder %v639_v16, 0.0 }
 0x248   :  { %v667_v19 = vsub.f32 %v624_v10, %v666_v18 }
 0x24a   :  { %v679_v21 = vadd.f32 %v678_v20, %v667_v19 }
 0x24c   :  { %v869_v22 = vpop.eup %868  ;;  %v680_v23 = vmax.f32 %v679_v21, 0.0 }
 0x24d   :  { %v706_v24 = vpop.xlane.xlu1 %705  ;;  %v641_v25 = vmul.f32 %v869_v22, %v639_v16  ;;  %v720_v27 = vpop.xlane.xlu0 %719 }
 0x24e   :  { %870 = vrsqrt.f32 %v680_v23  ;;  %v708_v8 = vmul.f32 2.0, %v706_v24  ;;  %vm688_vm6 = vcmp.eq.f32.partialorder %v680_v23, inf  ;;  %v691_v47 = vand.u32 2147483648, %v680_v23 }
 0x24f   :  { %v642_v11 = vmul.f32 %v869_v22, %v641_v25  ;;  %vm690_vm8 = vcmp.eq.f32.partialorder %v680_v23, 0.0 }
 0x250   :  { %v709_v26 = vsub.f32 %v624_v10, %v708_v8 }
 0x251   :  { %v643_v29 = vmul.f32 0.5, %v642_v11 }
 0x252   :  { %v721_v28 = vadd.f32 %v720_v27, %v709_v26 }
 0x253   :  { %v644_v33 = vsub.f32 1.5, %v643_v29 }
 0x254   :  { %v871_v30 = vpop.eup %870  ;;  %v722_v31 = vmax.f32 %v721_v28, 0.0 }
 0x255   :  { %v682_v32 = vmul.f32 %v871_v30, %v680_v23  ;;  %v645_v36 = vmul.f32 %v869_v22, %v644_v33 }
 0x256   :  { %872 = vrsqrt.f32 %v722_v31  ;;  %vm730_vm10 = vcmp.eq.f32.partialorder %v722_v31, inf  ;;  %v733_v56 = vand.u32 2147483648, %v722_v31  ;;  %vm732_vm11 = vcmp.eq.f32.partialorder %v722_v31, 0.0 }
 0x257   :  { %v683_v34 = vmul.f32 %v871_v30, %v682_v32  ;;  %v646_v42 = vmul.f32 %v645_v36, %v639_v16 }
 0x259   :  { %v684_v35 = vmul.f32 0.5, %v683_v34  ;;  %v648_v48 = vsel %vm647_vm7, %v639_v16, %v646_v42 }
 0x25a   :  { %v651_v53 = vsel %vm649_vm9, %v650_v50, %v648_v48 }
 0x25b   :  { %v685_v37 = vsub.f32 1.5, %v684_v35  ;;  %v652_v57 = vmul.f32 0.00390625, %v651_v53 }
 0x25c   :  { %v873_v38 = vpop.eup %872 }
 0x25d   :  { %v686_v40 = vmul.f32 %v871_v30, %v685_v37  ;;  %v724_v41 = vmul.f32 %v873_v38, %v722_v31 }
 0x25f   :  { %v687_v43 = vmul.f32 %v686_v40, %v680_v23  ;;  %v725_v44 = vmul.f32 %v873_v38, %v724_v41 }
 0x261   :  { %v689_v45 = vsel %vm688_vm6, %v680_v23, %v687_v43  ;;  %v726_v46 = vmul.f32 0.5, %v725_v44 }
 0x262   :  { %v692_v51 = vsel %vm690_vm8, %v691_v47, %v689_v45 }
 0x263   :  { %v727_v49 = vsub.f32 1.5, %v726_v46  ;;  %v693_v54 = vmul.f32 0.00390625, %v692_v51 }
 0x265   :  { %v728_v52 = vmul.f32 %v873_v38, %v727_v49  ;;  %v694_v60 = vadd.f32 %v693_v54, %v652_v57 }
 0x267   :  { %v729_v55 = vmul.f32 %v728_v52, %v722_v31 }
 0x269   :  { %v731_v58 = vsel %vm730_vm10, %v722_v31, %v729_v55 }
 0x26a   :  { %v734_v59 = vsel %vm732_vm11, %v733_v56, %v731_v58 }
 0x26b   :  { %v735_v61 = vmul.f32 0.00390625, %v734_v59 }
 0x26d   :  { %v736_v62 = vadd.f32 %v735_v61, %v694_v60 }
 0x26f   :  { %737 = vst.msk [vmem:[#allocation11] sm:$0x1] %vm51_vm5, %v736_v62 }
 0x270   :  { %792 = dma.vmem_to_hbm [thread:$0]  %s788_s13, 16, %s790_s0, [#allocation12]  }
 0x271   :  { %803 = dma.vmem_to_hbm [thread:$0]  %s799_s17, 16, %s801_s3, [#allocation12]  }
 0x272   :  { %994 = dma.done.wait [#allocation7], 64  }
 0x273   :  { %995 = vsyncadd [#allocation7], 4294967232 }
 0x274   :  { %996 = dma.done.wait [#allocation9], 128  }
 0x275   :  { %997 = vsyncadd [#allocation9], 4294967168 }
 0x276   :  { %998 = dma.done.wait [#allocation12], 32  }
 0x277   :  { %999 = vsyncadd [#allocation12], 4294967264 }
 0x278   :  { %832 = vsyncpa [#allocation7], 1 }
 0x279   :  { %833 = vsyncpa [#allocation9], 1 }
 0x27a   :  { %834 = vsyncpa [#allocation12], 1 }

</bundles_post_ra>
